<compile_context>
chip_gen: v7x
topology: tpu7x:2x2x1
jax: 0.10.0
libtpu: 0.0.40
codegen_flags: <defaults>
</compile_context>

<pallas_src>
import functools

import numpy as np
import jax
import jax.numpy as jnp
from jax.experimental import pallas as pl
from jax.experimental.pallas import tpu as pltpu

LOG2 = float(np.log(2.0))
EPS = 1e-10


def _round_up(v, m):
    return (v + m - 1) // m * m


def _ssp(v):
    # shifted softplus, numerically stable.
    return jnp.maximum(v, 0.0) + jnp.log(1.0 + jnp.exp(-jnp.abs(v))) - LOG2


def interaction_kernel(ea_ref, ew_ref, src_ref, dst_ref,      # edge-tiled streams
                       x_ref, pool_ref,                       # resident activations
                       wm1_ref, bm1_ref, wm2_ref, bm2_ref,    # filter MLP
                       w1_ref, w2_ref, b2_ref, wl_ref, bl_ref,  # lin1 / lin2 / lin
                       out_ref,
                       h_sc, agg_sc,
                       *, cutoff, n_pad):
    f32, bf16 = jnp.float32, jnp.bfloat16
    e_step = pl.program_id(0)
    te = src_ref.shape[0]

    @pl.when(e_step == 0)
    def _init():
        # CFConv.lin1 (no bias): computed once, kept resident (bf16) for every edge tile.
        h_sc[...] = jnp.dot(x_ref[...], w1_ref[...],
                            preferred_element_type=f32).astype(bf16)
        agg_sc[...] = jnp.zeros_like(agg_sc)

    # ---- filter network on this edge tile (bf16 MXU operands, f32 accumulation) ----
    ew = ew_ref[...]                                                   # [TE, 1] f32
    c = cutoff / (EPS + ew * ew) - 1.0                                 # [TE, 1]
    h1 = _ssp(jnp.dot(ea_ref[...], wm1_ref[...],
                      preferred_element_type=f32) + bm1_ref[...])      # [TE, Fp] f32
    w_filt = (jnp.dot(h1.astype(bf16), wm2_ref[...],
                      preferred_element_type=f32) + bm2_ref[...]) * c  # [TE, Fp] f32

    # ---- gather h[src] via in-kernel bf16 one-hot built from indices (native MXU) ----
    lane_nodes = jax.lax.broadcasted_iota(jnp.int32, (te, n_pad), 1)
    onehot_src = (src_ref[...] == lane_nodes).astype(bf16)             # [TE, Np] {0,1}
    h_j = jnp.dot(onehot_src, h_sc[...], preferred_element_type=f32)   # [TE, Fp] f32
    msg = (h_j * w_filt).astype(bf16)                                  # x_j * W

    # ---- scatter-add messages onto destination nodes (bf16 MXU, f32 accumulate) ----
    sub_nodes = jax.lax.broadcasted_iota(jnp.int32, (n_pad, te), 0)
    onehot_dst_t = (sub_nodes == dst_ref[...]).astype(bf16)            # [Np, TE] {0,1}
    agg_sc[...] += jnp.dot(onehot_dst_t, msg, preferred_element_type=f32)

    @pl.when(e_step == pl.num_programs(0) - 1)
    def _finalize():
        # per-component mean pool, CFConv.lin2, InteractionBlock.act + .lin (runs once)
        pooled = jnp.dot(pool_ref[...], agg_sc[...],
                         preferred_element_type=f32)                   # [Mp, Fp]
        y = _ssp(jnp.dot(pooled.astype(bf16), w2_ref[...],
                         preferred_element_type=f32) + b2_ref[...])
        out_ref[...] = (jnp.dot(y.astype(bf16), wl_ref[...],
                                preferred_element_type=f32)
                        + bl_ref[...]).astype(out_ref.dtype)


def _vmem_budget_bytes():
    """Generation-aware VMEM limit: ~3/4 of physical capacity, capped at 100 MiB
    (v5e/v6e: 128 MiB physical -> 96 MiB; v7x: 64 MiB physical -> 48 MiB)."""
    cap = 64 * 1024 * 1024  # conservative default (v7x has the smallest VMEM)
    try:
        info = pltpu.get_tpu_info()
        cap_attr = getattr(info, "vmem_capacity_bytes", None)
        if cap_attr:
            cap = int(cap_attr)
    except Exception:
        pass
    return int(min((cap * 3) // 4, 100 * 1024 * 1024))


def _resident_vmem_bytes(n_pad, h_pad, f_pad, m_pad, ng):
    """Rough VMEM bytes held by resident operands (double-buffered), scratch and output."""
    def tile(r, c, itemsize):
        return max(r, 8) * _round_up(c, 128) * itemsize
    resident = (tile(n_pad, h_pad, 2) + tile(m_pad, n_pad, 2)         # x, pool
                + tile(ng, f_pad, 2) + tile(1, f_pad, 4)              # mlp[0]
                + tile(f_pad, f_pad, 2) + tile(1, f_pad, 4)           # mlp[2]
                + tile(h_pad, f_pad, 2)                               # lin1
                + tile(f_pad, h_pad, 2) + tile(1, h_pad, 4)           # lin2
                + tile(h_pad, h_pad, 2) + tile(1, h_pad, 4))          # lin
    resident *= 2                                                     # default double-buffer
    scratch = n_pad * f_pad * (2 + 4)                                 # h_sc bf16 + agg f32
    out = 2 * tile(m_pad, h_pad, 4)
    return resident + scratch + out


def _auto_edge_tile(E, n_pad, ng, f_pad, vmem_budget, resident_bytes):
    """Pick TE so the per-tile one-hot temporaries + edge streams fit the VMEM budget."""
    per_edge = (2 * n_pad * 2          # two bf16 one-hot rows ([TE,Np] and [Np,TE])
                + 2 * n_pad * 4        # int32 iota rows backing the compares
                + 6 * f_pad * 4        # f32 row temporaries (h1, w_filt, h_j, msg, ...)
                + 2 * (_round_up(ng, 8) * 2 + 3 * 4))   # double-buffered edge streams
    avail = max(vmem_budget - resident_bytes, per_edge * 128)
    te = int(avail // per_edge)
    te = min(te, 2048, _round_up(E, 128))
    te = max(128, (te // 128) * 128)
    return te


def interaction_block(x, edge_attr, edge_weight, src, dst, pool_mat, params, cutoff,
                      *, edge_tile=None):
    N, H = x.shape
    E, NG = edge_attr.shape
    M = pool_mat.shape[0]
    F = params["w1"].shape[1]

    f32, bf16, i32 = jnp.float32, jnp.bfloat16, jnp.int32

    H_pad = _round_up(H, 128)
    F_pad = _round_up(F, 128)
    M_pad = _round_up(M, 8)
    N_pad = _round_up(N + 1, 128)       # lane-dense one-hots; >=1 zero sentinel node

    vmem_budget = _vmem_budget_bytes()
    resident_bytes = _resident_vmem_bytes(N_pad, H_pad, F_pad, M_pad, NG)
    if edge_tile is None:
        TE = _auto_edge_tile(E, N_pad, NG, F_pad, vmem_budget, resident_bytes)
    else:
        TE = max(128, _round_up(min(edge_tile, _round_up(E, 128)), 128))
    E_pad = _round_up(E, TE)
    n_tiles = E_pad // TE

    def pad2(a, rows, cols, dtype, fill=0):
        a = jnp.asarray(a, dtype)
        return jnp.pad(a, ((0, rows - a.shape[0]), (0, cols - a.shape[1])),
                       constant_values=fill)

    # streamed (edge-tiled) operands
    ea_p = pad2(edge_attr, E_pad, NG, bf16)
    ew_p = pad2(edge_weight.reshape(E, 1), E_pad, 1, f32, fill=1.0)
    src_p = pad2(src.reshape(E, 1), E_pad, 1, i32, fill=N)   # padded edges -> zero sentinel
    dst_p = pad2(dst.reshape(1, E), 1, E_pad, i32, fill=N)   # lane-major layout
    # resident operands (bf16 weights, f32 biases)
    x_p = pad2(x, N_pad, H_pad, bf16)
    pool_p = pad2(pool_mat, M_pad, N_pad, bf16)
    wm1_p = pad2(params["wm1"], NG, F_pad, bf16)
    bm1_p = pad2(params["bm1"], 1, F_pad, f32)
    wm2_p = pad2(params["wm2"], F_pad, F_pad, bf16)
    bm2_p = pad2(params["bm2"], 1, F_pad, f32)
    w1_p = pad2(params["w1"], H_pad, F_pad, bf16)
    w2_p = pad2(params["w2"], F_pad, H_pad, bf16)
    b2_p = pad2(params["b2"], 1, H_pad, f32)
    wl_p = pad2(params["wl"], H_pad, H_pad, bf16)
    bl_p = pad2(params["bl"], 1, H_pad, f32)

    edge_spec = lambda cols: pl.BlockSpec((TE, cols), lambda e: (e, 0))
    resident = lambda r, c: pl.BlockSpec((r, c), lambda e: (0, 0))

    in_specs = [
        edge_spec(NG),                              # edge_attr
        edge_spec(1),                               # edge_weight
        edge_spec(1),                               # src
        pl.BlockSpec((1, TE), lambda e: (0, e)),    # dst (row layout for scatter one-hot)
        resident(N_pad, H_pad),                     # x
        resident(M_pad, N_pad),                     # pool matrix
        resident(NG, F_pad), resident(1, F_pad),    # mlp[0]
        resident(F_pad, F_pad), resident(1, F_pad), # mlp[2]
        resident(H_pad, F_pad),                     # lin1 (no bias)
        resident(F_pad, H_pad), resident(1, H_pad), # lin2
        resident(H_pad, H_pad), resident(1, H_pad), # lin
    ]

    kernel = functools.partial(interaction_kernel, cutoff=float(cutoff), n_pad=N_pad)

    out = pl.pallas_call(
        kernel,
        out_shape=jax.ShapeDtypeStruct((M_pad, H_pad), jnp.float32),
        grid_spec=pltpu.PrefetchScalarGridSpec(
            num_scalar_prefetch=0,
            grid=(n_tiles,),
            in_specs=in_specs,
            out_specs=pl.BlockSpec((M_pad, H_pad), lambda e: (0, 0)),
            scratch_shapes=[pltpu.VMEM((N_pad, F_pad), jnp.bfloat16),  # h = lin1(x)
                            pltpu.VMEM((N_pad, F_pad), jnp.float32)],  # scatter accumulator
        ),
        compiler_params=pltpu.CompilerParams(
            dimension_semantics=("arbitrary",),        # edge axis is a reduction
            vmem_limit_bytes=vmem_budget),
    )(ea_p, ew_p, src_p, dst_p, x_p, pool_p,
      wm1_p, bm1_p, wm2_p, bm2_p, w1_p, w2_p, b2_p, wl_p, bl_p)

    return out[:M, :H]


def _xavier(key, fan_in, fan_out):
    # stored pre-transposed ([in, out]); same xavier bound as torch's [out, in] weight
    bound = float(np.sqrt(6.0 / (fan_in + fan_out)))
    return jax.random.uniform(key, (fan_in, fan_out), jnp.float32, -bound, bound)


if __name__ == "__main__":
    # hidden_channels, num_gaussians, num_filters, cutoff
    H, NG, F, cutoff = 32, 16, 32, 10.0
    N, E = 16, 32                       # nodes, edges

    key = jax.random.PRNGKey(0)
    ks = jax.random.split(key, 11)

    x = jax.random.normal(ks[0], (N, H), jnp.float32)
    edge_attr = jax.random.normal(ks[1], (E, NG), jnp.float32)
    edge_weight = jax.random.uniform(ks[2], (E,), jnp.float32, 0.5, cutoff)
    src = jax.random.randint(ks[3], (E,), 0, N)      # edge_index[0]
    dst = jax.random.randint(ks[4], (E,), 0, N)      # edge_index[1]

    # idx_comp['batch_c_index']: 2 graphs x 2 components each -> M = 4 pooled rows
    batch_c_index = [[np.array([0, 1, 2]), np.array([3, 4, 5, 6, 7])],
                     [np.array([8, 9, 10, 11]), np.array([12, 13, 14, 15])]]
    M = sum(len(b) for b in batch_c_index)
    pool_np = np.zeros((M, N), np.float32)
    row = 0
    for b in batch_c_index:
        for comp in b:
            pool_np[row, comp] = 1.0 / len(comp)     # mean over the component's nodes
            row += 1
    pool_mat = jnp.asarray(pool_np)

    params = {
        "wm1": _xavier(ks[5], NG, F), "bm1": jnp.zeros((1, F), jnp.float32),
        "wm2": _xavier(ks[6], F, F),
        # mlp[2].bias is NOT reset in the torch module -> keep a nonzero default-style init
        "bm2": jax.random.uniform(ks[10], (1, F), jnp.float32,
                                  -1.0 / float(np.sqrt(F)), 1.0 / float(np.sqrt(F))),
        "w1":  _xavier(ks[7], H, F),                                          # CFConv.lin1
        "w2":  _xavier(ks[8], F, H),  "b2":  jnp.zeros((1, H), jnp.float32),  # CFConv.lin2
        "wl":  _xavier(ks[9], H, H),  "bl":  jnp.zeros((1, H), jnp.float32),  # Interaction.lin
    }

    out = interaction_block(x, edge_attr, edge_weight, src, dst, pool_mat, params, cutoff)
    out = jax.block_until_ready(out)

    # ---- float64 numpy reference on the same bf16-rounded operands ----
    def bfr(a):   # apply the exact same bf16 rounding the kernel inputs get
        return np.asarray(jnp.asarray(a).astype(jnp.bfloat16).astype(jnp.float32),
                          dtype=np.float64)

    def ssp_np(v):
        return np.logaddexp(v, 0.0) - LOG2

    ea_r, x_r, pool_r = bfr(edge_attr), bfr(x), bfr(pool_mat)
    wm1_r, wm2_r = bfr(params["wm1"]), bfr(params["wm2"])
    w1_r, w2_r, wl_r = bfr(params["w1"]), bfr(params["w2"]), bfr(params["wl"])
    bm1_r = np.asarray(params["bm1"], np.float64)
    bm2_r = np.asarray(params["bm2"], np.float64)
    b2_r = np.asarray(params["b2"], np.float64)
    bl_r = np.asarray(params["bl"], np.float64)
    ew_r = np.asarray(edge_weight, np.float64)
    src_r, dst_r = np.asarray(src), np.asarray(dst)

    c_r = (cutoff / (EPS + ew_r ** 2) - 1.0)[:, None]
    wf = (ssp_np(ea_r @ wm1_r + bm1_r) @ wm2_r + bm2_r) * c_r
    h = x_r @ w1_r
    msg = h[src_r] * wf
    agg = np.zeros((N, F), np.float64)
    np.add.at(agg, dst_r, msg)
    pooled = pool_r @ agg
    ref = ssp_np(pooled @ w2_r + b2_r) @ wl_r + bl_r

    out_np = np.asarray(out, np.float64)
    err = float(np.max(np.abs(out_np - ref)))
    scale = max(1.0, float(np.max(np.abs(ref))))
    assert out.shape == (M, H)
    # bf16 MXU operands + bf16 intermediate casts (h_sc, msg, pooled, y): check the max
    # abs error against ~2.5% of the output scale (structural bugs would be O(scale)).
    assert err <= 2.5e-2 * scale, "max abs err = %g (scale %g)" % (err, scale)
    print("KERNEL_OK")
</pallas_src>

<mosaic_0001>
module attributes {stable_mosaic.version = 11 : i64} {
  func.func @interaction_kernel(%arg0: i32, %arg1: memref<128x16xbf16, #tpu.memory_space<vmem>>, %arg2: memref<128x1xf32, #tpu.memory_space<vmem>>, %arg3: memref<128x1xi32, #tpu.memory_space<vmem>>, %arg4: memref<1x128xi32, #tpu.memory_space<vmem>>, %arg5: memref<128x128xbf16, #tpu.memory_space<vmem>>, %arg6: memref<8x128xbf16, #tpu.memory_space<vmem>>, %arg7: memref<16x128xbf16, #tpu.memory_space<vmem>>, %arg8: memref<1x128xf32, #tpu.memory_space<vmem>>, %arg9: memref<128x128xbf16, #tpu.memory_space<vmem>>, %arg10: memref<1x128xf32, #tpu.memory_space<vmem>>, %arg11: memref<128x128xbf16, #tpu.memory_space<vmem>>, %arg12: memref<128x128xbf16, #tpu.memory_space<vmem>>, %arg13: memref<1x128xf32, #tpu.memory_space<vmem>>, %arg14: memref<128x128xbf16, #tpu.memory_space<vmem>>, %arg15: memref<1x128xf32, #tpu.memory_space<vmem>>, %arg16: memref<8x128xf32, #tpu.memory_space<vmem>>, %arg17: memref<128x128xbf16, #tpu.memory_space<vmem>>, %arg18: memref<128x128xf32, #tpu.memory_space<vmem>>) attributes {dimension_semantics = [#tpu.dimension_semantics<arbitrary>], iteration_bounds = array<i64: 1>, scalar_prefetch = 0 : i64, scratch_operands = 2 : i64, tpu.core_type = #tpu.core_type<tc>, window_params = [{transform_indices = @transform_0, window_bounds = array<i64: 128, 16>}, {transform_indices = @transform_1, window_bounds = array<i64: 128, 1>}, {transform_indices = @transform_2, window_bounds = array<i64: 128, 1>}, {transform_indices = @transform_3, window_bounds = array<i64: 1, 128>}, {pipeline_mode = #tpu.pipeline_mode<synchronous>, transform_indices = @transform_4, window_bounds = array<i64: 128, 128>}, {pipeline_mode = #tpu.pipeline_mode<synchronous>, transform_indices = @transform_5, window_bounds = array<i64: 8, 128>}, {pipeline_mode = #tpu.pipeline_mode<synchronous>, transform_indices = @transform_6, window_bounds = array<i64: 16, 128>}, {pipeline_mode = #tpu.pipeline_mode<synchronous>, transform_indices = @transform_7, window_bounds = array<i64: 1, 128>}, {pipeline_mode = #tpu.pipeline_mode<synchronous>, transform_indices = @transform_8, window_bounds = array<i64: 128, 128>}, {pipeline_mode = #tpu.pipeline_mode<synchronous>, transform_indices = @transform_9, window_bounds = array<i64: 1, 128>}, {pipeline_mode = #tpu.pipeline_mode<synchronous>, transform_indices = @transform_10, window_bounds = array<i64: 128, 128>}, {pipeline_mode = #tpu.pipeline_mode<synchronous>, transform_indices = @transform_11, window_bounds = array<i64: 128, 128>}, {pipeline_mode = #tpu.pipeline_mode<synchronous>, transform_indices = @transform_12, window_bounds = array<i64: 1, 128>}, {pipeline_mode = #tpu.pipeline_mode<synchronous>, transform_indices = @transform_13, window_bounds = array<i64: 128, 128>}, {pipeline_mode = #tpu.pipeline_mode<synchronous>, transform_indices = @transform_14, window_bounds = array<i64: 1, 128>}, {pipeline_mode = #tpu.pipeline_mode<synchronous>, transform_indices = @transform_15, window_bounds = array<i64: 8, 128>}]} {
    %c0_i32 = arith.constant 0 : i32
    %0 = arith.cmpi eq, %arg0, %c0_i32 : i32
    %1 = arith.extui %0 : i1 to i32
    %c0_i32_0 = arith.constant 0 : i32
    %2 = arith.cmpi ne, %1, %c0_i32_0 : i32
    scf.if %2 {
      %c0_34 = arith.constant 0 : index
      %c0_35 = arith.constant 0 : index
      %62 = vector.load %arg5[%c0_34, %c0_35] : memref<128x128xbf16, #tpu.memory_space<vmem>>, vector<128x128xbf16>
      %c0_36 = arith.constant 0 : index
      %c0_37 = arith.constant 0 : index
      %63 = vector.load %arg11[%c0_36, %c0_37] : memref<128x128xbf16, #tpu.memory_space<vmem>>, vector<128x128xbf16>
      %cst_38 = arith.constant dense<0.000000e+00> : vector<128x128xf32>
      %64 = tpu.matmul %62, %63, %cst_38 {dimension_numbers = #tpu.dot_dimension_numbers<[1], [0], [0], [1], [0, 0, 1, 1], [], []>} : vector<128x128xbf16>, vector<128x128xbf16>, vector<128x128xf32> -> vector<128x128xf32>
      %65 = arith.truncf %64 : vector<128x128xf32> to vector<128x128xbf16>
      %c0_39 = arith.constant 0 : index
      %c0_40 = arith.constant 0 : index
      %66 = vector.load %arg17[%c0_39, %c0_40] : memref<128x128xbf16, #tpu.memory_space<vmem>>, vector<128x128xbf16>
      tpu.vector_store %arg17[%c0_39, %c0_40], %65 {strides = array<i32>} : memref<128x128xbf16, #tpu.memory_space<vmem>>, vector<128x128xbf16>,
      %cst_41 = arith.constant 0.000000e+00 : f32
      %67 = vector.broadcast %cst_41 : f32 to vector<128x128xf32>
      %c0_42 = arith.constant 0 : index
      %c0_43 = arith.constant 0 : index
      %68 = vector.load %arg18[%c0_42, %c0_43] : memref<128x128xf32, #tpu.memory_space<vmem>>, vector<128x128xf32>
      tpu.vector_store %arg18[%c0_42, %c0_43], %67 {strides = array<i32>} : memref<128x128xf32, #tpu.memory_space<vmem>>, vector<128x128xf32>,
    } else {
    }
    %c0 = arith.constant 0 : index
    %c0_1 = arith.constant 0 : index
    %3 = vector.load %arg2[%c0, %c0_1] : memref<128x1xf32, #tpu.memory_space<vmem>>, vector<128x1xf32>
    %4 = arith.mulf %3, %3 : vector<128x1xf32>
    %cst = arith.constant 1.000000e-10 : f32
    %5 = vector.broadcast %cst : f32 to vector<128x1xf32>
    %6 = arith.addf %5, %4 : vector<128x1xf32>
    %cst_2 = arith.constant 1.000000e+01 : f32
    %7 = vector.broadcast %cst_2 : f32 to vector<128x1xf32>
    %8 = arith.divf %7, %6 : vector<128x1xf32>
    %cst_3 = arith.constant 1.000000e+00 : f32
    %9 = vector.broadcast %cst_3 : f32 to vector<128x1xf32>
    %10 = arith.subf %8, %9 : vector<128x1xf32>
    %c0_4 = arith.constant 0 : index
    %c0_5 = arith.constant 0 : index
    %11 = vector.load %arg1[%c0_4, %c0_5] : memref<128x16xbf16, #tpu.memory_space<vmem>>, vector<128x16xbf16>
    %c0_6 = arith.constant 0 : index
    %c0_7 = arith.constant 0 : index
    %12 = vector.load %arg7[%c0_6, %c0_7] : memref<16x128xbf16, #tpu.memory_space<vmem>>, vector<16x128xbf16>
    %cst_8 = arith.constant dense<0.000000e+00> : vector<128x128xf32>
    %13 = tpu.matmul %11, %12, %cst_8 {dimension_numbers = #tpu.dot_dimension_numbers<[1], [0], [0], [1], [0, 0, 1, 1], [], []>} : vector<128x16xbf16>, vector<16x128xbf16>, vector<128x128xf32> -> vector<128x128xf32>
    %c0_9 = arith.constant 0 : index
    %c0_10 = arith.constant 0 : index
    %14 = vector.load %arg8[%c0_9, %c0_10] : memref<1x128xf32, #tpu.memory_space<vmem>>, vector<1x128xf32>
    %15 = vector.broadcast %14 : vector<1x128xf32> to vector<128x128xf32>
    %16 = arith.addf %13, %15 : vector<128x128xf32>
    %cst_11 = arith.constant 0.000000e+00 : f32
    %17 = vector.broadcast %cst_11 : f32 to vector<128x128xf32>
    %18 = arith.maximumf %16, %17 : vector<128x128xf32>
    %19 = math.absf %16 : vector<128x128xf32>
    %cst_12 = arith.constant 0.000000e+00 : f32
    %20 = vector.broadcast %cst_12 : f32 to vector<128x128xf32>
    %21 = arith.subf %20, %19 : vector<128x128xf32>
    %22 = math.exp %21 : vector<128x128xf32>
    %cst_13 = arith.constant 1.000000e+00 : f32
    %23 = vector.broadcast %cst_13 : f32 to vector<128x128xf32>
    %24 = arith.addf %23, %22 : vector<128x128xf32>
    %25 = math.log %24 : vector<128x128xf32>
    %26 = arith.addf %18, %25 : vector<128x128xf32>
    %cst_14 = arith.constant 0.693147182 : f32
    %27 = vector.broadcast %cst_14 : f32 to vector<128x128xf32>
    %28 = arith.subf %26, %27 : vector<128x128xf32>
    %29 = arith.truncf %28 : vector<128x128xf32> to vector<128x128xbf16>
    %c0_15 = arith.constant 0 : index
    %c0_16 = arith.constant 0 : index
    %30 = vector.load %arg9[%c0_15, %c0_16] : memref<128x128xbf16, #tpu.memory_space<vmem>>, vector<128x128xbf16>
    %cst_17 = arith.constant dense<0.000000e+00> : vector<128x128xf32>
    %31 = tpu.matmul %29, %30, %cst_17 {dimension_numbers = #tpu.dot_dimension_numbers<[1], [0], [0], [1], [0, 0, 1, 1], [], []>} : vector<128x128xbf16>, vector<128x128xbf16>, vector<128x128xf32> -> vector<128x128xf32>
    %c0_18 = arith.constant 0 : index
    %c0_19 = arith.constant 0 : index
    %32 = vector.load %arg10[%c0_18, %c0_19] : memref<1x128xf32, #tpu.memory_space<vmem>>, vector<1x128xf32>
    %33 = vector.broadcast %32 : vector<1x128xf32> to vector<128x128xf32>
    %34 = arith.addf %31, %33 : vector<128x128xf32>
    %35 = vector.broadcast %10 : vector<128x1xf32> to vector<128x128xf32>
    %36 = arith.mulf %34, %35 : vector<128x128xf32>
    %37 = tpu.iota {dimensions = array<i32: 1>} : vector<128x128xi32>
    %c0_20 = arith.constant 0 : index
    %c0_21 = arith.constant 0 : index
    %38 = vector.load %arg3[%c0_20, %c0_21] : memref<128x1xi32, #tpu.memory_space<vmem>>, vector<128x1xi32>
    %39 = vector.broadcast %38 : vector<128x1xi32> to vector<128x128xi32>
    %40 = arith.cmpi eq, %39, %37 : vector<128x128xi32>
    %41 = arith.extui %40 : vector<128x128xi1> to vector<128x128xi32>
    %42 = arith.sitofp %41 : vector<128x128xi32> to vector<128x128xf32>
    %43 = arith.truncf %42 : vector<128x128xf32> to vector<128x128xbf16>
    %c0_22 = arith.constant 0 : index
    %c0_23 = arith.constant 0 : index
    %44 = vector.load %arg17[%c0_22, %c0_23] : memref<128x128xbf16, #tpu.memory_space<vmem>>, vector<128x128xbf16>
    %cst_24 = arith.constant dense<0.000000e+00> : vector<128x128xf32>
    %45 = tpu.matmul %43, %44, %cst_24 {dimension_numbers = #tpu.dot_dimension_numbers<[1], [0], [0], [1], [0, 0, 1, 1], [], []>} : vector<128x128xbf16>, vector<128x128xbf16>, vector<128x128xf32> -> vector<128x128xf32>
    %46 = arith.mulf %45, %36 : vector<128x128xf32>
    %47 = arith.truncf %46 : vector<128x128xf32> to vector<128x128xbf16>
    %48 = tpu.iota {dimensions = array<i32: 0>} : vector<128x128xi32>
    %c0_25 = arith.constant 0 : index
    %c0_26 = arith.constant 0 : index
    %49 = vector.load %arg4[%c0_25, %c0_26] : memref<1x128xi32, #tpu.memory_space<vmem>>, vector<1x128xi32>
    %50 = vector.broadcast %49 : vector<1x128xi32> to vector<128x128xi32>
    %51 = arith.cmpi eq, %48, %50 : vector<128x128xi32>
    %52 = arith.extui %51 : vector<128x128xi1> to vector<128x128xi32>
    %53 = arith.sitofp %52 : vector<128x128xi32> to vector<128x128xf32>
    %54 = arith.truncf %53 : vector<128x128xf32> to vector<128x128xbf16>
    %c0_27 = arith.constant 0 : index
    %c0_28 = arith.constant 0 : index
    %55 = vector.load %arg18[%c0_27, %c0_28] : memref<128x128xf32, #tpu.memory_space<vmem>>, vector<128x128xf32>
    %cst_29 = arith.constant dense<0.000000e+00> : vector<128x128xf32>
    %56 = tpu.matmul %54, %47, %cst_29 {dimension_numbers = #tpu.dot_dimension_numbers<[1], [0], [0], [1], [0, 0, 1, 1], [], []>} : vector<128x128xbf16>, vector<128x128xbf16>, vector<128x128xf32> -> vector<128x128xf32>
    %57 = arith.addf %55, %56 : vector<128x128xf32>
    %c0_30 = arith.constant 0 : index
    %c0_31 = arith.constant 0 : index
    %58 = vector.load %arg18[%c0_30, %c0_31] : memref<128x128xf32, #tpu.memory_space<vmem>>, vector<128x128xf32>
    tpu.vector_store %arg18[%c0_30, %c0_31], %57 {strides = array<i32>} : memref<128x128xf32, #tpu.memory_space<vmem>>, vector<128x128xf32>,
    %c0_i32_32 = arith.constant 0 : i32
    %59 = arith.cmpi eq, %arg0, %c0_i32_32 : i32
    %60 = arith.extui %59 : i1 to i32
    %c0_i32_33 = arith.constant 0 : i32
    %61 = arith.cmpi ne, %60, %c0_i32_33 : i32
    scf.if %61 {
      %c0_34 = arith.constant 0 : index
      %c0_35 = arith.constant 0 : index
      %62 = vector.load %arg6[%c0_34, %c0_35] : memref<8x128xbf16, #tpu.memory_space<vmem>>, vector<8x128xbf16>
      %c0_36 = arith.constant 0 : index
      %c0_37 = arith.constant 0 : index
      %63 = vector.load %arg18[%c0_36, %c0_37] : memref<128x128xf32, #tpu.memory_space<vmem>>, vector<128x128xf32>
      %cst_38 = arith.constant dense<0.000000e+00> : vector<8x128xf32>
      %64 = tpu.matmul %62, %63, %cst_38 {dimension_numbers = #tpu.dot_dimension_numbers<[1], [0], [0], [1], [0, 0, 1, 1], [], []>} : vector<8x128xbf16>, vector<128x128xf32>, vector<8x128xf32> -> vector<8x128xf32>
      %65 = arith.truncf %64 : vector<8x128xf32> to vector<8x128xbf16>
      %c0_39 = arith.constant 0 : index
      %c0_40 = arith.constant 0 : index
      %66 = vector.load %arg12[%c0_39, %c0_40] : memref<128x128xbf16, #tpu.memory_space<vmem>>, vector<128x128xbf16>
      %cst_41 = arith.constant dense<0.000000e+00> : vector<8x128xf32>
      %67 = tpu.matmul %65, %66, %cst_41 {dimension_numbers = #tpu.dot_dimension_numbers<[1], [0], [0], [1], [0, 0, 1, 1], [], []>} : vector<8x128xbf16>, vector<128x128xbf16>, vector<8x128xf32> -> vector<8x128xf32>
      %c0_42 = arith.constant 0 : index
      %c0_43 = arith.constant 0 : index
      %68 = vector.load %arg13[%c0_42, %c0_43] : memref<1x128xf32, #tpu.memory_space<vmem>>, vector<1x128xf32>
      %69 = vector.broadcast %68 : vector<1x128xf32> to vector<8x128xf32>
      %70 = arith.addf %67, %69 : vector<8x128xf32>
      %cst_44 = arith.constant 0.000000e+00 : f32
      %71 = vector.broadcast %cst_44 : f32 to vector<8x128xf32>
      %72 = arith.maximumf %70, %71 : vector<8x128xf32>
      %73 = math.absf %70 : vector<8x128xf32>
      %cst_45 = arith.constant 0.000000e+00 : f32
      %74 = vector.broadcast %cst_45 : f32 to vector<8x128xf32>
      %75 = arith.subf %74, %73 : vector<8x128xf32>
      %76 = math.exp %75 : vector<8x128xf32>
      %cst_46 = arith.constant 1.000000e+00 : f32
      %77 = vector.broadcast %cst_46 : f32 to vector<8x128xf32>
      %78 = arith.addf %77, %76 : vector<8x128xf32>
      %79 = math.log %78 : vector<8x128xf32>
      %80 = arith.addf %72, %79 : vector<8x128xf32>
      %cst_47 = arith.constant 0.693147182 : f32
      %81 = vector.broadcast %cst_47 : f32 to vector<8x128xf32>
      %82 = arith.subf %80, %81 : vector<8x128xf32>
      %83 = arith.truncf %82 : vector<8x128xf32> to vector<8x128xbf16>
      %c0_48 = arith.constant 0 : index
      %c0_49 = arith.constant 0 : index
      %84 = vector.load %arg14[%c0_48, %c0_49] : memref<128x128xbf16, #tpu.memory_space<vmem>>, vector<128x128xbf16>
      %cst_50 = arith.constant dense<0.000000e+00> : vector<8x128xf32>
      %85 = tpu.matmul %83, %84, %cst_50 {dimension_numbers = #tpu.dot_dimension_numbers<[1], [0], [0], [1], [0, 0, 1, 1], [], []>} : vector<8x128xbf16>, vector<128x128xbf16>, vector<8x128xf32> -> vector<8x128xf32>
      %c0_51 = arith.constant 0 : index
      %c0_52 = arith.constant 0 : index
      %86 = vector.load %arg15[%c0_51, %c0_52] : memref<1x128xf32, #tpu.memory_space<vmem>>, vector<1x128xf32>
      %87 = vector.broadcast %86 : vector<1x128xf32> to vector<8x128xf32>
      %88 = arith.addf %85, %87 : vector<8x128xf32>
      %c0_53 = arith.constant 0 : index
      %c0_54 = arith.constant 0 : index
      %89 = vector.load %arg16[%c0_53, %c0_54] : memref<8x128xf32, #tpu.memory_space<vmem>>, vector<8x128xf32>
      tpu.vector_store %arg16[%c0_53, %c0_54], %88 {strides = array<i32>} : memref<8x128xf32, #tpu.memory_space<vmem>>, vector<8x128xf32>,
    } else {
    }
    return
  }
  func.func @transform_0(%arg0: i32) -> (i32, i32) {
    %c0_i32 = arith.constant 0 : i32
    %c0_i32_0 = arith.constant 0 : i32
    return %arg0, %c0_i32 : i32, i32
  }
  func.func @transform_1(%arg0: i32) -> (i32, i32) {
    %c0_i32 = arith.constant 0 : i32
    %c0_i32_0 = arith.constant 0 : i32
    return %arg0, %c0_i32 : i32, i32
  }
  func.func @transform_2(%arg0: i32) -> (i32, i32) {
    %c0_i32 = arith.constant 0 : i32
    %c0_i32_0 = arith.constant 0 : i32
    return %arg0, %c0_i32 : i32, i32
  }
  func.func @transform_3(%arg0: i32) -> (i32, i32) {
    %c0_i32 = arith.constant 0 : i32
    %c0_i32_0 = arith.constant 0 : i32
    return %c0_i32, %arg0 : i32, i32
  }
  func.func @transform_4(%arg0: i32) -> (i32, i32) {
    %c0_i32 = arith.constant 0 : i32
    %c0_i32_0 = arith.constant 0 : i32
    %c0_i32_1 = arith.constant 0 : i32
    return %c0_i32, %c0_i32_0 : i32, i32
  }
  func.func @transform_5(%arg0: i32) -> (i32, i32) {
    %c0_i32 = arith.constant 0 : i32
    %c0_i32_0 = arith.constant 0 : i32
    %c0_i32_1 = arith.constant 0 : i32
    return %c0_i32, %c0_i32_0 : i32, i32
  }
  func.func @transform_6(%arg0: i32) -> (i32, i32) {
    %c0_i32 = arith.constant 0 : i32
    %c0_i32_0 = arith.constant 0 : i32
    %c0_i32_1 = arith.constant 0 : i32
    return %c0_i32, %c0_i32_0 : i32, i32
  }
  func.func @transform_7(%arg0: i32) -> (i32, i32) {
    %c0_i32 = arith.constant 0 : i32
    %c0_i32_0 = arith.constant 0 : i32
    %c0_i32_1 = arith.constant 0 : i32
    return %c0_i32, %c0_i32_0 : i32, i32
  }
  func.func @transform_8(%arg0: i32) -> (i32, i32) {
    %c0_i32 = arith.constant 0 : i32
    %c0_i32_0 = arith.constant 0 : i32
    %c0_i32_1 = arith.constant 0 : i32
    return %c0_i32, %c0_i32_0 : i32, i32
  }
  func.func @transform_9(%arg0: i32) -> (i32, i32) {
    %c0_i32 = arith.constant 0 : i32
    %c0_i32_0 = arith.constant 0 : i32
    %c0_i32_1 = arith.constant 0 : i32
    return %c0_i32, %c0_i32_0 : i32, i32
  }
  func.func @transform_10(%arg0: i32) -> (i32, i32) {
    %c0_i32 = arith.constant 0 : i32
    %c0_i32_0 = arith.constant 0 : i32
    %c0_i32_1 = arith.constant 0 : i32
    return %c0_i32, %c0_i32_0 : i32, i32
  }
  func.func @transform_11(%arg0: i32) -> (i32, i32) {
    %c0_i32 = arith.constant 0 : i32
    %c0_i32_0 = arith.constant 0 : i32
    %c0_i32_1 = arith.constant 0 : i32
    return %c0_i32, %c0_i32_0 : i32, i32
  }
  func.func @transform_12(%arg0: i32) -> (i32, i32) {
    %c0_i32 = arith.constant 0 : i32
    %c0_i32_0 = arith.constant 0 : i32
    %c0_i32_1 = arith.constant 0 : i32
    return %c0_i32, %c0_i32_0 : i32, i32
  }
  func.func @transform_13(%arg0: i32) -> (i32, i32) {
    %c0_i32 = arith.constant 0 : i32
    %c0_i32_0 = arith.constant 0 : i32
    %c0_i32_1 = arith.constant 0 : i32
    return %c0_i32, %c0_i32_0 : i32, i32
  }
  func.func @transform_14(%arg0: i32) -> (i32, i32) {
    %c0_i32 = arith.constant 0 : i32
    %c0_i32_0 = arith.constant 0 : i32
    %c0_i32_1 = arith.constant 0 : i32
    return %c0_i32, %c0_i32_0 : i32, i32
  }
  func.func @transform_15(%arg0: i32) -> (i32, i32) {
    %c0_i32 = arith.constant 0 : i32
    %c0_i32_0 = arith.constant 0 : i32
    %c0_i32_1 = arith.constant 0 : i32
    return %c0_i32, %c0_i32_0 : i32, i32
  }
}

</mosaic_0001>

<bundles_post_ra>
// kernel: tpu_custom_call.1
= control target key start
LH: loop header
LB: loop body
LE: loop exit
PB: predicated region body
PF: predicated region fallthrough
CT: control target
= control target key end

     0   :  { %vm480_vm0 = vcmask 130048   ;;  %v2543_v3 = vmov 0   ;;  %s3124_s0 = inlined_call_operand.vmem [shape: bf16[128,16], index: 0, kind: input, shape index: {}]   ;;  %s3125_s1 = inlined_call_operand.vmem [shape: f32[128,1], index: 1, kind: input, shape index: {}]   ;;  %s3126_s2 = inlined_call_operand.vmem [shape: s32[128,1], index: 2, kind: input, shape index: {}]   ;;  %s3127_s3 = inlined_call_operand.vmem [shape: s32[1,128], index: 3, kind: input, shape index: {}]   ;;  %s3128_s4 = inlined_call_operand.vmem [shape: bf16[128,128], index: 4, kind: input, shape index: {}]   ;;  %s3129_s5 = inlined_call_operand.vmem [shape: bf16[8,128], index: 5, kind: input, shape index: {}]   ;;  %s3130_s6 = inlined_call_operand.vmem [shape: bf16[16,128], index: 6, kind: input, shape index: {}]   ;;  %s3131_s7 = inlined_call_operand.vmem [shape: f32[1,128], index: 7, kind: input, shape index: {}]   ;;  %s3132_s8 = inlined_call_operand.vmem [shape: bf16[128,128], index: 8, kind: input, shape index: {}]   ;;  %s3133_s9 = inlined_call_operand.vmem [shape: f32[1,128], index: 9, kind: input, shape index: {}]   ;;  %s3134_s10 = inlined_call_operand.vmem [shape: bf16[128,128], index: 10, kind: input, shape index: {}]   ;;  %s3135_s11 = inlined_call_operand.vmem [shape: bf16[128,128], index: 11, kind: input, shape index: {}]   ;;  %s3136_s12 = inlined_call_operand.vmem [shape: f32[1,128], index: 12, kind: input, shape index: {}]   ;;  %s3137_s13 = inlined_call_operand.vmem [shape: bf16[128,128], index: 13, kind: input, shape index: {}]   ;;  %s3138_s14 = inlined_call_operand.vmem [shape: f32[1,128], index: 14, kind: input, shape index: {}]   ;;  %s3139_s15 = inlined_call_operand.hbm [shape: f32[8,128], index: 15, kind: output, shape index: {}]  }
   0x1   :  { %v2370_v0 = vld [vmem:[%s3134_s10] sm:$0xff]   ;;  %2368 = vset.pattern.permute.xlu0 %v2543_v3  ;;  %v2373_v4 = vld [vmem:[%s3134_s10 + $0x8] sm:$0xff]   ;;  %v2375_v6 = vld [vmem:[%s3134_s10 + $0x10] sm:$0xff]   ;;  %2369 = vset.pattern.permute.xlu1 %v2543_v3 }
   0x2   :  { %v2371_v1 = vld [vmem:[%s3130_s6] sm:$0xff]   ;;  %2116 = vmatprep.subr.bf16.mxu0 %v2370_v0  ;;  %v2374_v5 = vld [vmem:[%s3124_s0 + $0x8] sm:$0xff]   ;;  %v2376_v7 = vld [vmem:[%s3124_s0 + $0x10] sm:$0xff]  }
   0x3   :  { %v2372_v2 = vld [vmem:[%s3124_s0] sm:$0xff]   ;;  %2148 = vmatprep.subr.bf16.mxu1 %v2371_v1  ;;  %2117 = vmatpush3.bf16.msra.mxu0 %v2370_v0  ;;  %v2377_v8 = vld [vmem:[%s3134_s10 + $0x18] sm:$0xff]   ;;  %v2381_v12 = vld [vmem:[%s3134_s10 + $0x28] sm:$0xff]  }
   0x4   :  { %2149 = vmatpush3.bf16.msra.mxu1 %v2371_v1  ;;  %2150 = vmatprep.mubr.msk.bf16.mxu1 %vm480_vm0, %v2372_v2  ;;  %v2378_v9 = vld [vmem:[%s3124_s0 + $0x18] sm:$0xff]   ;;  %v2379_v10 = vld [vmem:[%s3134_s10 + $0x20] sm:$0xff]   ;;  %v2382_v14 = vld [vmem:[%s3124_s0 + $0x28] sm:$0xff]  }
   0x5   :  { %2118 = vmatprep.subr.bf16.mxu0 %v2373_v4  ;;  %v2380_v11 = vld [vmem:[%s3124_s0 + $0x20] sm:$0xff]   ;;  %v2383_v15 = vld [vmem:[%s3134_s10 + $0x30] sm:$0xff]   ;;  %v2385_v17 = vld [vmem:[%s3134_s10 + $0x38] sm:$0xff]  }
   0x6   :  { %v2387_v13 = vld [vmem:[%s3128_s4] sm:$0xff]   ;;  %v2384_v16 = vld [vmem:[%s3124_s0 + $0x30] sm:$0xff]   ;;  %v2386_v20 = vld [vmem:[%s3124_s0 + $0x38] sm:$0xff]  }
   0x7   :  { %2151 = vmatmul.mubr.msk.bf16.vlgmr.msra.gmra.mrb[0].mxu1 %vm480_vm0, %v2374_v5  ;;  %2119 = vmatpush3.bf16.msra.mxu0 %v2373_v4  ;;  %v1036_v18 = vld [vmem:[%s3126_s2] sm:$0xff]  ;;  %v1038_v19 = vld [vmem:[%s3126_s2 + $0x10] sm:$0xff]  ;;  %v1037_v21 = vld [vmem:[%s3126_s2 + $0x8] sm:$0xff] }
   0x8   :  { %2120 = vmatprep.subr.bf16.mxu0 %v2375_v6  ;;  %2154 = vmatprep.mubr.msk.bf16.mxu1 %vm480_vm0, %v2376_v7  ;;  %v1039_v22 = vld [vmem:[%s3126_s2 + $0x18] sm:$0xff]  ;;  %v2388_v23 = vld [vmem:[%s3128_s4 + $0x8] sm:$0xff]   ;;  %v2389_v24 = vld [vmem:[%s3128_s4 + $0x10] sm:$0xff]  }
   0x9   :  { %2132 = vmatprep.mubr.bf16.mxu0 %v2387_v13  ;;  %1053 = vperm.xlu0 %2368, %v1036_v18   ;;  %v313_v25 = vld [vmem:[%s3125_s1] sm:$0xff]  ;;  %v314_v26 = vld [vmem:[%s3125_s1 + $0x8] sm:$0xff]  ;;  %v315_v30 = vld [vmem:[%s3125_s1 + $0x10] sm:$0xff] }
   0xa   :  { %1059 = vperm.xlu1 %2369, %v1038_v19   ;;  %v1040_v27 = vld [vmem:[%s3126_s2 + $0x20] sm:$0xff]  ;;  %v329_v28 = vmul.f32 %v313_v25, %v313_v25  ;;  %v330_v29 = vmul.f32 %v314_v26, %v314_v26  ;;  %v316_v31 = vld [vmem:[%s3125_s1 + $0x18] sm:$0xff]  ;;  %v1041_v32 = vld [vmem:[%s3126_s2 + $0x28] sm:$0xff]  ;;  %v331_v34 = vmul.f32 %v315_v30, %v315_v30 }
   0xb   :  { %2121 = vmatpush3.bf16.msra.mxu0 %v2375_v6  ;;  %v317_v35 = vld [vmem:[%s3125_s1 + $0x20] sm:$0xff]  ;;  %v332_v37 = vmul.f32 %v316_v31, %v316_v31  ;;  %v318_v38 = vld [vmem:[%s3125_s1 + $0x28] sm:$0xff]  ;;  %v1042_v39 = vld [vmem:[%s3126_s2 + $0x30] sm:$0xff] }
   0xc   :  { %2122 = vmatprep.subr.bf16.mxu0 %v2377_v8  ;;  %v345_v33 = vadd.f32 1e-10, %v329_v28  ;;  %v346_v36 = vadd.f32 1e-10, %v330_v29  ;;  %v319_v40 = vld [vmem:[%s3125_s1 + $0x30] sm:$0xff]  ;;  %v1043_v41 = vld [vmem:[%s3126_s2 + $0x38] sm:$0xff]  ;;  %v333_v42 = vmul.f32 %v317_v35, %v317_v35  ;;  %v334_v46 = vmul.f32 %v318_v38, %v318_v38 }
   0xd   :  { %1056 = vperm.xlu0 %2368, %v1037_v21   ;;  %v2390_v43 = vld [vmem:[%s3128_s4 + $0x18] sm:$0xff]   ;;  %v2391_v44 = vld [vmem:[%s3128_s4 + $0x20] sm:$0xff]   ;;  %v347_v45 = vadd.f32 1e-10, %v331_v34  ;;  %v1045_v48 = vld [vmem:[%s3126_s2 + $0x48] sm:$0xff]  ;;  %v335_v50 = vmul.f32 %v319_v40, %v319_v40 }
   0xe   :  { %1062 = vperm.xlu1 %2369, %v1039_v22   ;;  %2419 = vrcp.f32 %v345_v33  ;;  %v1044_v47 = vld [vmem:[%s3126_s2 + $0x40] sm:$0xff]  ;;  %v348_v49 = vadd.f32 1e-10, %v332_v37  ;;  %v320_v51 = vld [vmem:[%s3125_s1 + $0x38] sm:$0xff]  ;;  %v349_v53 = vadd.f32 1e-10, %v333_v42 }
   0xf   :  { %2155 = vmatmul.mubr.msk.bf16.gmra.mrb[4].mxu1 %vm480_vm0, %v2378_v9  ;;  %2123 = vmatpush3.bf16.msra.mxu0 %v2377_v8  ;;  %2421 = vrcp.f32 %v346_v36  ;;  %v321_v52 = vld [vmem:[%s3125_s1 + $0x40] sm:$0xff]  ;;  %v322_v54 = vld [vmem:[%s3125_s1 + $0x48] sm:$0xff]  ;;  %v1046_v55 = vld [vmem:[%s3126_s2 + $0x50] sm:$0xff]  ;;  %v350_v56 = vadd.f32 1e-10, %v334_v46  ;;  %v336_v59 = vmul.f32 %v320_v51, %v320_v51 }
  0x10   :  { %2124 = vmatprep.subr.bf16.mxu0 %v2379_v10  ;;  %2158 = vmatprep.mubr.msk.bf16.mxu1 %vm480_vm0, %v2380_v11  ;;  %2423 = vrcp.f32 %v347_v45  ;;  %v1047_v57 = vld [vmem:[%s3126_s2 + $0x58] sm:$0xff]  ;;  %v351_v58 = vadd.f32 1e-10, %v335_v50  ;;  %v323_v60 = vld [vmem:[%s3125_s1 + $0x50] sm:$0xff]  ;;  %v2392_v61 = vld [vmem:[%s3128_s4 + $0x28] sm:$0xff]   ;;  %v337_v62 = vmul.f32 %v321_v52, %v321_v52  ;;  %v338_v2 = vmul.f32 %v322_v54, %v322_v54 }
  0x11   :  { %1065 = vperm.xlu0 %2368, %v1040_v27   ;;  %2425 = vrcp.f32 %v348_v49  ;;  %v324_v63 = vld [vmem:[%s3125_s1 + $0x58] sm:$0xff]  ;;  %v2393_v0 = vld [vmem:[%s3128_s4 + $0x30] sm:$0xff]   ;;  %v1048_v1 = vld [vmem:[%s3126_s2 + $0x60] sm:$0xff]  ;;  %v352_v4 = vadd.f32 1e-10, %v336_v59  ;;  %v339_v9 = vmul.f32 %v323_v60, %v323_v60 }
  0x12   :  { %1068 = vperm.xlu1 %2369, %v1041_v32   ;;  %2427 = vrcp.f32 %v349_v53  ;;  %v1049_v3 = vld [vmem:[%s3126_s2 + $0x68] sm:$0xff]  ;;  %v325_v6 = vld [vmem:[%s3125_s1 + $0x60] sm:$0xff]  ;;  %v353_v8 = vadd.f32 1e-10, %v337_v62  ;;  %v354_v11 = vadd.f32 1e-10, %v338_v2 }
  0x13   :  { %2125 = vmatpush3.bf16.msra.mxu0 %v2379_v10  ;;  %2429 = vrcp.f32 %v350_v56  ;;  %v1050_v10 = vld [vmem:[%s3126_s2 + $0x70] sm:$0xff]  ;;  %v2394_v19 = vld [vmem:[%s3128_s4 + $0x38] sm:$0xff]   ;;  %v341_v21 = vmul.f32 %v325_v6, %v325_v6 }
  0x14   :  { %2126 = vmatprep.subr.bf16.mxu0 %v2381_v12  ;;  %2431 = vrcp.f32 %v351_v58  ;;  %v327_v22 = vld [vmem:[%s3125_s1 + $0x70] sm:$0xff]  ;;  %v328_v25 = vld [vmem:[%s3125_s1 + $0x78] sm:$0xff] }
  0x15   :  { %1071 = vperm.xlu0 %2368, %v1042_v39   ;;  %2433 = vrcp.f32 %v352_v4  ;;  %v357_v32 = vadd.f32 1e-10, %v341_v21  ;;  %v343_v34 = vmul.f32 %v327_v22, %v327_v22  ;;  %v344_v37 = vmul.f32 %v328_v25, %v328_v25 }
  0x16   :  { %1074 = vperm.xlu1 %2369, %v1043_v41   ;;  %2435 = vrcp.f32 %v353_v8 }
  0x17   :  { %2159 = vmatmul.mubr.msk.bf16.gmra.mrb[8].mxu1 %vm480_vm0, %v2382_v14  ;;  %2127 = vmatpush3.bf16.msra.mxu0 %v2381_v12  ;;  %v340_v12 = vmul.f32 %v324_v63, %v324_v63  ;;  %v326_v14 = vld [vmem:[%s3125_s1 + $0x68] sm:$0xff]  ;;  %2437 = vrcp.f32 %v354_v11  ;;  %v359_v42 = vadd.f32 1e-10, %v343_v34 }
  0x18   :  { %2128 = vmatprep.subr.bf16.mxu0 %v2383_v15  ;;  %2162 = vmatprep.mubr.msk.bf16.mxu1 %vm480_vm0, %v2384_v16  ;;  %v2420_v5 = vpop.eup %2419  ;;  %v1051_v16 = vld [vmem:[%s3126_s2 + $0x78] sm:$0xff] }
  0x19   :  { %1077 = vperm.xlu0 %2368, %v1044_v47   ;;  %v2422_v7 = vpop.eup %2421  ;;  %v362_v13 = vmul.f32 10.0, %v2420_v5 }
  0x1a   :  { %1080 = vperm.xlu1 %2369, %v1045_v48  }
  0x1b   :  { %2129 = vmatpush3.bf16.msra.mxu0 %v2383_v15  ;;  %v2424_v15 = vpop.eup %2423  ;;  %v1865_v26 = vadd.f32 -1.0, %v362_v13 }
  0x1c   :  { %2130 = vmatprep.subr.bf16.mxu0 %v2385_v17  ;;  %v2426_v18 = vpop.eup %2425  ;;  %v366_v27 = vmul.f32 10.0, %v2424_v15 }
  0x1d   :  { %1083 = vperm.xlu0 %2368, %v1046_v55   ;;  %v2428_v28 = vpop.eup %2427  ;;  %v368_v30 = vmul.f32 10.0, %v2426_v18 }
  0x1e   :  { %1086 = vperm.xlu1 %2369, %v1047_v57   ;;  %v2430_v31 = vpop.eup %2429  ;;  %v1867_v35 = vadd.f32 -1.0, %v366_v27  ;;  %v370_v36 = vmul.f32 10.0, %v2428_v28 }
  0x1f   :  { %2163 = vmatmul.mubr.msk.bf16.gmra.mrb[12].mxu1 %vm480_vm0, %v2386_v20  ;;  %2131 = vmatpush3.bf16.msra.mxu0 %v2385_v17  ;;  %v364_v17 = vmul.f32 10.0, %v2422_v7  ;;  %v355_v20 = vadd.f32 1e-10, %v339_v9  ;;  %v2432_v38 = vpop.eup %2431  ;;  %v1868_v39 = vadd.f32 -1.0, %v368_v30  ;;  %v372_v40 = vmul.f32 10.0, %v2430_v31 }
  0x20   :  { %v2434_v41 = vpop.eup %2433 }
  0x21   :  { %1089 = vperm.xlu0 %2368, %v1048_v1   ;;  %v1866_v29 = vadd.f32 -1.0, %v364_v17  ;;  %2439 = vrcp.f32 %v355_v20 }
  0x22   :  { %2133 = vmatmul.mubr.bf16.vlgmr.msra.gmra.mrb[0].mxu0 %v2388_v23  ;;  %1092 = vperm.xlu1 %2369, %v1049_v3   ;;  %v356_v23 = vadd.f32 1e-10, %v340_v12 }
  0x23   :  { %2136 = vmatprep.mubr.bf16.mxu0 %v2389_v24  ;;  %v342_v24 = vmul.f32 %v326_v14, %v326_v14 }
  0x24   :  { %2441 = vrcp.f32 %v356_v23 }
  0x25   :  { %1095 = vperm.xlu0 %2368, %v1050_v10   ;;  %v358_v33 = vadd.f32 1e-10, %v342_v24  ;;  %2443 = vrcp.f32 %v357_v32 }
  0x26   :  { %1098 = vperm.xlu1 %2369, %v1051_v16  }
  0x29   :  { %940 = vperm.xlu0 %2368, %v1865_v26  }
  0x2a   :  { %2137 = vmatmul.mubr.bf16.gmra.mrb[4].mxu0 %v2390_v43  ;;  %945 = vperm.xlu1 %2369, %v1866_v29  }
  0x2b   :  { %2140 = vmatprep.mubr.bf16.mxu0 %v2391_v44 }
  0x32   :  { %2141 = vmatmul.mubr.bf16.gmra.mrb[8].mxu0 %v2392_v61 }
  0x33   :  { %2144 = vmatprep.mubr.bf16.mxu0 %v2393_v0 }
  0x3a   :  { %2145 = vmatmul.mubr.bf16.gmra.mrb[12].mxu0 %v2394_v19 }
  0x3b   :  { %20 = vsyncpa [#allocation5], 0  ;;  %950 = vperm.xlu0 %2368, %v1867_v35   ;;  %v1869_v43 = vadd.f32 -1.0, %v370_v36  ;;  %v374_v44 = vmul.f32 10.0, %v2432_v38  ;;  %2445 = vrcp.f32 %v358_v33  ;;  %v360_v45 = vadd.f32 1e-10, %v344_v37  ;;  %v2436_v46 = vpop.eup %2435  ;;  %955 = vperm.xlu1 %2369, %v1868_v39  }
  0x3c   :  { %v1870_v47 = vadd.f32 -1.0, %v372_v40  ;;  %v376_v48 = vmul.f32 10.0, %v2434_v41  ;;  %v2438_v49 = vpop.eup %2437  ;;  %2447 = vrcp.f32 %v359_v42  ;;  %v378_v51 = vmul.f32 10.0, %v2436_v46  ;;  %v2395_v10 = vld [vmem:[%s3132_s8] sm:$0xff]   ;;  %v2396_v11 = vld [vmem:[%s3132_s8 + $0x8] sm:$0xff]   ;;  %v2397_v12 = vld [vmem:[%s3132_s8 + $0x10] sm:$0xff]  }
  0x3d   :  { %v1871_v50 = vadd.f32 -1.0, %v374_v44  ;;  %2449 = vrcp.f32 %v360_v45  ;;  %v2440_v52 = vpop.eup %2439  ;;  %v380_v54 = vmul.f32 10.0, %v2438_v49  ;;  %2166 = vmatprep.subr.bf16.mxu1 %v2395_v10  ;;  %v2398_v13 = vld [vmem:[%s3132_s8 + $0x18] sm:$0xff]   ;;  %v2399_v14 = vld [vmem:[%s3132_s8 + $0x20] sm:$0xff]   ;;  %v2400_v15 = vld [vmem:[%s3132_s8 + $0x28] sm:$0xff]   ;;  %v1034_v18 = vlaneseq  ;;  %s2548_s29 = smov [#allocation4]  }
  0x3e   :  { %v1872_v53 = vadd.f32 -1.0, %v376_v48  ;;  %v2442_v55 = vpop.eup %2441  ;;  %v1873_v56 = vadd.f32 -1.0, %v378_v51  ;;  %v382_v57 = vmul.f32 10.0, %v2440_v52  ;;  %2167 = vmatpush3.bf16.msra.mxu1 %v2395_v10  ;;  %v2401_v16 = vld [vmem:[%s3132_s8 + $0x30] sm:$0xff]   ;;  %v2402_v17 = vld [vmem:[%s3132_s8 + $0x38] sm:$0xff]   ;;  %s1841_s30 = sshll.u32 %s2548_s29, 4  ;;  %s1842_s30 = int_to_ptr.vmem [resolvable:$true] %s1841_s30 }
  0x3f   :  { %960 = vperm.xlu0 %2368, %v1869_v43   ;;  %965 = vperm.xlu1 %2369, %v1870_v47   ;;  %v2444_v58 = vpop.eup %2443  ;;  %v1874_v59 = vadd.f32 -1.0, %v380_v54  ;;  %v384_v60 = vmul.f32 10.0, %v2442_v55  ;;  %v2833_v19 = vand.u32 127, %v1034_v18  ;;  %v2544_v22 = vmov 1.0|1.0   ;;  %s2519_s16 = scalar_lea.vmem %s1842_s30, 128  ;;  %p2524_p1 = scmp.lt.s32.totalorder %s1842_s30, %s1842_s30 }
  0x40   :  { %v1875_v62 = vadd.f32 -1.0, %v382_v57  ;;  %v386_v63 = vmul.f32 10.0, %v2444_v58  ;;  %2168 = vmatprep.subr.bf16.mxu1 %v2396_v11  ;;  %v2841_v23 = vld [vmem:[%s3131_s7] ss:$0 sm:$0xff]  ;;  %p2520_p0 = scmp.ne.s32.totalorder %s1842_s30, %s2519_s16  ;;  %p2525_p2 = scmp.lt.s32.totalorder %s2519_s16, %s2519_s16 }
  0x41   :  { %v1876_v1 = vadd.f32 -1.0, %v384_v60 }
  0x42   :  { %v1877_v4 = vadd.f32 -1.0, %v386_v63  ;;  %2169 = vmatpush3.bf16.msra.mxu1 %v2396_v11  ;;  %p2526_p3 = por %p2525_p2, %p2524_p1 }
  0x43   :  { %970 = vperm.xlu0 %2368, %v1871_v50   ;;  %975 = vperm.xlu1 %2369, %v1872_v53  }
  0x44   :  { %2170 = vmatprep.subr.bf16.mxu1 %v2397_v12  ;;  %p2527_p4 = pnand %p2526_p3, %p2520_p0 }
  0x45   :  { %v2446_v61 = vpop.eup %2445 }
  0x46   :  { %v2448_v0 = vpop.eup %2447  ;;  %v388_v2 = vmul.f32 10.0, %v2446_v61  ;;  %2171 = vmatpush3.bf16.msra.mxu1 %v2397_v12 }
  0x47   :  { %980 = vperm.xlu0 %2368, %v1873_v56   ;;  %985 = vperm.xlu1 %2369, %v1874_v59   ;;  %v2450_v3 = vpop.eup %2449  ;;  %v390_v5 = vmul.f32 10.0, %v2448_v0 }
  0x48   :  { %v1878_v6 = vadd.f32 -1.0, %v388_v2  ;;  %v392_v7 = vmul.f32 10.0, %v2450_v3  ;;  %2172 = vmatprep.subr.bf16.mxu1 %v2398_v13 }
  0x49   :  { %v1879_v8 = vadd.f32 -1.0, %v390_v5 }
  0x4a   :  { %v1880_v9 = vadd.f32 -1.0, %v392_v7  ;;  %2173 = vmatpush3.bf16.msra.mxu1 %v2398_v13 }
  0x4b   :  { %990 = vperm.xlu0 %2368, %v1875_v62   ;;  %995 = vperm.xlu1 %2369, %v1876_v1  }
  0x4c   :  { %2174 = vmatprep.subr.bf16.mxu1 %v2399_v14 }
  0x4e   :  { %2175 = vmatpush3.bf16.msra.mxu1 %v2399_v14 }
  0x4f   :  { %1000 = vperm.xlu0 %2368, %v1877_v4   ;;  %1005 = vperm.xlu1 %2369, %v1878_v6  }
  0x50   :  { %2176 = vmatprep.subr.bf16.mxu1 %v2400_v15 }
  0x52   :  { %2177 = vmatpush3.bf16.msra.mxu1 %v2400_v15 }
  0x53   :  { %1010 = vperm.xlu0 %2368, %v1879_v8   ;;  %1015 = vperm.xlu1 %2369, %v1880_v9  }
  0x54   :  { %2178 = vmatprep.subr.bf16.mxu1 %v2401_v16 }
  0x56   :  { %2179 = vmatpush3.bf16.msra.mxu1 %v2401_v16 }
  0x57   :  { %2180 = vmatprep.subr.bf16.mxu1 %v2402_v17 }
  0x5a   :  { %2181 = vmatpush3.bf16.msra.mxu1 %v2402_v17 }
  0x88   :  { %v1054_v20 = vpop.permute.xlu0 %1053 }
  0x89   :  { %vm1100_vm1 = vcmp.eq.s32.totalorder %v1054_v20, %v2833_v19 }
  0x8c   :  { %v1057_v21 = vpop.permute.xlu0 %1056 }
  0x8d   :  { %vm1101_vm2 = vcmp.eq.s32.totalorder %v1057_v21, %v2833_v19 }
  0x8e   :  { %vm1940_vm3 = vmpackc.low %vm1101_vm2, %vm1100_vm1 }
  0x8f   :  { %2214 = vmatprep.mubr.msk.bf16.mxu0 %vm1940_vm3, %v2544_v22 }
  0xda   :  { %v2152_v24 = vpop.f32.mrb[0].mxu1 }
  0xdb   :  { %v2844_v25 = vadd.f32 %v2152_v24, %v2841_v23  ;;  %v539_v26 = vpop.f32.mrb[1].mxu1 }
  0xdc   :  { %v2847_v27 = vadd.f32 %v2841_v23, %v539_v26  ;;  %v2153_v28 = vpop.f32.mrb[2].mxu1 }
  0xdd   :  { %v620_v29 = vand.u32 2147483647, %v2844_v25  ;;  %v2851_v30 = vadd.f32 %v2153_v28, %v2841_v23  ;;  %v542_v31 = vpop.f32.mrb[3].mxu1 }
  0xde   :  { %v618_v32 = vand.u32 2147483647, %v2847_v27  ;;  %v2855_v33 = vadd.f32 %v2841_v23, %v542_v31 }
  0xdf   :  { %v636_v34 = vsub.f32 0.0, %v620_v29  ;;  %v621_v35 = vand.u32 2147483647, %v2851_v30 }
  0xe0   :  { %v634_v36 = vsub.f32 0.0, %v618_v32  ;;  %v619_v37 = vand.u32 2147483647, %v2855_v33 }
  0xe1   :  { %v654_v38 = vmul.f32 1.442695, %v636_v34  ;;  %v637_v39 = vsub.f32 0.0, %v621_v35 }
  0xe2   :  { %v650_v40 = vmul.f32 1.442695, %v634_v36  ;;  %v635_v41 = vsub.f32 0.0, %v619_v37  ;;  %v2156_v42 = vpop.f32.mrb[4].mxu1 }
  0xe3   :  { %2451 = vpow2.f32 %v654_v38  ;;  %v656_v43 = vmul.f32 1.442695, %v637_v39  ;;  %v2860_v44 = vadd.f32 %v2156_v42, %v2841_v23  ;;  %v555_v45 = vpop.f32.mrb[5].mxu1 }
  0xe4   :  { %2453 = vpow2.f32 %v650_v40  ;;  %v652_v46 = vmul.f32 1.442695, %v635_v41  ;;  %v2863_v47 = vadd.f32 %v2841_v23, %v555_v45  ;;  %v2157_v48 = vpop.f32.mrb[6].mxu1  ;;  %v604_v41 = vmax.f32 %v2844_v25, 0.0 }
  0xe5   :  { %2455 = vpow2.f32 %v656_v43  ;;  %v624_v49 = vand.u32 2147483647, %v2860_v44  ;;  %v2867_v50 = vadd.f32 %v2157_v48, %v2841_v23  ;;  %v558_v51 = vpop.f32.mrb[7].mxu1 }
  0xe6   :  { %2457 = vpow2.f32 %v652_v46  ;;  %v622_v52 = vand.u32 2147483647, %v2863_v47  ;;  %v2871_v53 = vadd.f32 %v2841_v23, %v558_v51 }
  0xe7   :  { %v640_v54 = vsub.f32 0.0, %v624_v49  ;;  %v625_v55 = vand.u32 2147483647, %v2867_v50  ;;  %v602_v49 = vmax.f32 %v2847_v27, 0.0 }
  0xe8   :  { %v638_v56 = vsub.f32 0.0, %v622_v52  ;;  %v623_v57 = vand.u32 2147483647, %v2871_v53 }
  0xe9   :  { %v662_v58 = vmul.f32 1.442695, %v640_v54  ;;  %v641_v59 = vsub.f32 0.0, %v625_v55 }
  0xea   :  { %v658_v60 = vmul.f32 1.442695, %v638_v56  ;;  %v639_v61 = vsub.f32 0.0, %v623_v57  ;;  %v2160_v62 = vpop.f32.mrb[8].mxu1  ;;  %v605_v56 = vmax.f32 %v2851_v30, 0.0  ;;  %v603_v30 = vmax.f32 %v2855_v33, 0.0 }
  0xeb   :  { %2459 = vpow2.f32 %v662_v58  ;;  %v664_v63 = vmul.f32 1.442695, %v641_v59  ;;  %v2876_v0 = vadd.f32 %v2160_v62, %v2841_v23  ;;  %v571_v1 = vpop.f32.mrb[9].mxu1 }
  0xec   :  { %2461 = vpow2.f32 %v658_v60  ;;  %v660_v2 = vmul.f32 1.442695, %v639_v61  ;;  %v2879_v3 = vadd.f32 %v2841_v23, %v571_v1  ;;  %v2161_v4 = vpop.f32.mrb[10].mxu1 }
  0xed   :  { %v2452_v5 = vpop.eup %2451  ;;  %2463 = vpow2.f32 %v664_v63  ;;  %v628_v6 = vand.u32 2147483647, %v2876_v0  ;;  %v2883_v7 = vadd.f32 %v2161_v4, %v2841_v23  ;;  %v574_v8 = vpop.f32.mrb[11].mxu1 }
  0xee   :  { %v2454_v9 = vpop.eup %2453  ;;  %v684_v10 = vadd.f32 1.0, %v2452_v5  ;;  %2465 = vpow2.f32 %v660_v2  ;;  %v626_v11 = vand.u32 2147483647, %v2879_v3  ;;  %v2888_v21 = vadd.f32 %v2841_v23, %v574_v8 }
  0xef   :  { %v2456_v12 = vpop.eup %2455  ;;  %v682_v13 = vadd.f32 1.0, %v2454_v9  ;;  %v644_v14 = vsub.f32 0.0, %v628_v6  ;;  %v629_v15 = vand.u32 2147483647, %v2883_v7 }
  0xf0   :  { %v2458_v16 = vpop.eup %2457  ;;  %2467 = vlog2.f32 %v684_v10  ;;  %v685_v17 = vadd.f32 1.0, %v2456_v12  ;;  %v642_v20 = vsub.f32 0.0, %v626_v11  ;;  %v627_v31 = vand.u32 2147483647, %v2888_v21 }
  0xf1   :  { %2469 = vlog2.f32 %v682_v13  ;;  %v683_v24 = vadd.f32 1.0, %v2458_v16  ;;  %v670_v26 = vmul.f32 1.442695, %v644_v14  ;;  %v645_v28 = vsub.f32 0.0, %v629_v15 }
  0xf2   :  { %2471 = vlog2.f32 %v685_v17  ;;  %v666_v29 = vmul.f32 1.442695, %v642_v20  ;;  %v2164_v32 = vpop.f32.mrb[12].mxu1  ;;  %v643_v37 = vsub.f32 0.0, %v627_v31 }
  0xf3   :  { %2473 = vlog2.f32 %v683_v24  ;;  %v672_v34 = vmul.f32 1.442695, %v645_v28  ;;  %v2892_v35 = vadd.f32 %v2164_v32, %v2841_v23  ;;  %v587_v36 = vpop.f32.mrb[13].mxu1 }
  0xf4   :  { %2475 = vpow2.f32 %v670_v26  ;;  %v2895_v38 = vadd.f32 %v2841_v23, %v587_v36  ;;  %v2165_v39 = vpop.f32.mrb[14].mxu1  ;;  %v668_v52 = vmul.f32 1.442695, %v643_v37 }
  0xf5   :  { %v2460_v40 = vpop.eup %2459  ;;  %2477 = vpow2.f32 %v666_v29  ;;  %v632_v42 = vand.u32 2147483647, %v2892_v35  ;;  %v2900_v43 = vadd.f32 %v2165_v39, %v2841_v23  ;;  %v590_v45 = vpop.f32.mrb[15].mxu1 }
  0xf6   :  { %v2134_v46 = vpop.f32.mrb[0].mxu0  ;;  %v2462_v48 = vpop.eup %2461  ;;  %v688_v51 = vadd.f32 1.0, %v2460_v40  ;;  %2479 = vpow2.f32 %v672_v34  ;;  %v630_v58 = vand.u32 2147483647, %v2895_v38  ;;  %v2907_v63 = vadd.f32 %v2841_v23, %v590_v45 }
  0xf7   :  { %v218_v54 = vpop.f32.mrb[1].mxu0  ;;  %v2464_v55 = vpop.eup %2463  ;;  %v686_v57 = vadd.f32 1.0, %v2462_v48  ;;  %v648_v25 = vsub.f32 0.0, %v632_v42  ;;  %v633_v62 = vand.u32 2147483647, %v2900_v43 }
  0xf8   :  { %v2135_v59 = vpop.f32.mrb[2].mxu0  ;;  %v2466_v60 = vpop.eup %2465  ;;  %2481 = vlog2.f32 %v688_v51  ;;  %v689_v61 = vadd.f32 1.0, %v2464_v55  ;;  %v646_v4 = vsub.f32 0.0, %v630_v58  ;;  %v631_v8 = vand.u32 2147483647, %v2907_v63 }
  0xf9   :  { %v221_v27 = vpop.f32.mrb[3].mxu0  ;;  %2483 = vlog2.f32 %v686_v57  ;;  %v687_v1 = vadd.f32 1.0, %v2466_v60  ;;  %v678_v2 = vmul.f32 1.442695, %v648_v25  ;;  %v649_v6 = vsub.f32 0.0, %v633_v62 }
  0xfa   :  { %v2468_v5 = vpop.eup %2467  ;;  %2485 = vlog2.f32 %v689_v61  ;;  %v674_v11 = vmul.f32 1.442695, %v646_v4  ;;  %v282_v12 = vpack.c.bf16 %v2135_v59, %v2134_v46  ;;  %v647_v15 = vsub.f32 0.0, %v631_v8 }
  0xfb   :  { %v2470_v9 = vpop.eup %2469  ;;  %v703_v10 = vmul.f32 0.6931472, %v2468_v5  ;;  %2487 = vlog2.f32 %v687_v1  ;;  %v680_v14 = vmul.f32 1.442695, %v649_v6  ;;  %v281_v24 = vpack.c.bf16 %v221_v27, %v218_v54 }
  0xfc   :  { %v2472_v13 = vpop.eup %2471  ;;  %v699_v23 = vmul.f32 0.6931472, %v2470_v9  ;;  %2489 = vpow2.f32 %v668_v52  ;;  %v676_v31 = vmul.f32 1.442695, %v647_v15  ;;  %v608_v58 = vmax.f32 %v2860_v44, 0.0 }
  0xfd   :  { %v2474_v16 = vpop.eup %2473  ;;  %v732_v17 = vadd.f32 %v703_v10, %v604_v41  ;;  %v705_v20 = vmul.f32 0.6931472, %v2472_v13  ;;  %2491 = vpow2.f32 %v678_v2  ;;  %v2138_v33 = vpop.f32.mrb[4].mxu0  ;;  %2198 = vmatprep.subr.bf16.mxu0 %v281_v24  ;;  %v606_v61 = vmax.f32 %v2863_v47, 0.0 }
  0xfe   :  { %v2476_v26 = vpop.eup %2475  ;;  %v730_v28 = vadd.f32 %v699_v23, %v602_v49  ;;  %v701_v29 = vmul.f32 0.6931472, %v2474_v16  ;;  %2493 = vpow2.f32 %v674_v11  ;;  %v234_v32 = vpop.f32.mrb[5].mxu0  ;;  %2199 = vmatpush3.bf16.msra.mxu0 %v281_v24  ;;  %v609_v4 = vmax.f32 %v2867_v50, 0.0 }
  0xff   :  { %v2478_v34 = vpop.eup %2477  ;;  %v733_v36 = vadd.f32 %v705_v20, %v605_v56  ;;  %v692_v37 = vadd.f32 1.0, %v2476_v26  ;;  %2495 = vpow2.f32 %v680_v14  ;;  %v2139_v39 = vpop.f32.mrb[6].mxu0  ;;  %v1901_v42 = vadd.f32 -0.6931472, %v732_v17  ;;  %2200 = vmatprep.subr.bf16.mxu0 %v282_v12 }
 0x100   :  { %v2480_v40 = vpop.eup %2479  ;;  %v731_v45 = vadd.f32 %v701_v29, %v603_v30  ;;  %v690_v41 = vadd.f32 1.0, %v2478_v34  ;;  %2497 = vpow2.f32 %v676_v31  ;;  %v237_v46 = vpop.f32.mrb[7].mxu0  ;;  %v284_v51 = vpack.c.bf16 %v2139_v39, %v2138_v33 }
 0x101   :  { %v1902_v48 = vadd.f32 -0.6931472, %v733_v36  ;;  %2499 = vlog2.f32 %v692_v37  ;;  %v693_v49 = vadd.f32 1.0, %v2480_v40  ;;  %v1899_v54 = vadd.f32 -0.6931472, %v730_v28  ;;  %v2915_v13 = vpop.permute.xlu1 %1059 }
 0x102   :  { %v2482_v52 = vpop.eup %2481  ;;  %v1900_v55 = vadd.f32 -0.6931472, %v731_v45  ;;  %2501 = vlog2.f32 %v690_v41  ;;  %v283_v56 = vpack.c.bf16 %v237_v46, %v234_v32  ;;  %2201 = vmatpush3.bf16.msra.mxu0 %v282_v12  ;;  %v607_v9 = vmax.f32 %v2871_v53, 0.0 }
 0x103   :  { %v2484_v57 = vpop.eup %2483  ;;  %v763_v25 = vpack.c.bf16 %v1902_v48, %v1901_v42  ;;  %v711_v59 = vmul.f32 0.6931472, %v2482_v52  ;;  %2503 = vlog2.f32 %v693_v49  ;;  %v612_v40 = vmax.f32 %v2876_v0, 0.0 }
 0x104   :  { %v2486_v60 = vpop.eup %2485  ;;  %v707_v62 = vmul.f32 0.6931472, %v2484_v57  ;;  %v762_v27 = vpack.c.bf16 %v1900_v55, %v1899_v54  ;;  %2202 = vmatprep.subr.bf16.mxu0 %v283_v56  ;;  %v613_v52 = vmax.f32 %v2883_v7, 0.0  ;;  %vm1102_vm4 = vcmp.eq.s32.totalorder %v2915_v13, %v2833_v19 }
 0x105   :  { %v2488_v1 = vpop.eup %2487  ;;  %v736_v2 = vadd.f32 %v711_v59, %v608_v58  ;;  %v713_v5 = vmul.f32 0.6931472, %v2486_v60  ;;  %v2142_v30 = vpop.f32.mrb[8].mxu0  ;;  %v610_v60 = vmax.f32 %v2879_v3, 0.0  ;;  %v614_v3 = vmax.f32 %v2895_v38, 0.0 }
 0x106   :  { %v2490_v6 = vpop.eup %2489  ;;  %v734_v8 = vadd.f32 %v707_v62, %v606_v61  ;;  %v709_v44 = vmul.f32 0.6931472, %v2488_v1  ;;  %2182 = vmatprep.mubr.bf16.mxu1 %v762_v27  ;;  %v250_v10 = vpop.f32.mrb[9].mxu0  ;;  %2203 = vmatpush3.bf16.msra.mxu0 %v283_v56 }
 0x107   :  { %v2492_v11 = vpop.eup %2491  ;;  %v737_v47 = vadd.f32 %v713_v5, %v609_v4  ;;  %v691_v12 = vadd.f32 1.0, %v2490_v6  ;;  %2183 = vmatmul.mubr.bf16.vlgmr.msra.gmra.mrb[16].mxu1 %v763_v25  ;;  %v2143_v23 = vpop.f32.mrb[10].mxu0  ;;  %v1905_v15 = vadd.f32 -0.6931472, %v736_v2  ;;  %2204 = vmatprep.subr.bf16.mxu0 %v284_v51  ;;  %v611_v4 = vmax.f32 %v2888_v21, 0.0 }
 0x108   :  { %v2494_v14 = vpop.eup %2493  ;;  %v735_v50 = vadd.f32 %v709_v44, %v607_v9  ;;  %v696_v16 = vadd.f32 1.0, %v2492_v11  ;;  %v286_v17 = vpack.c.bf16 %v2143_v23, %v2142_v30  ;;  %v253_v20 = vpop.f32.mrb[11].mxu0  ;;  %v1903_v29 = vadd.f32 -0.6931472, %v734_v8 }
 0x109   :  { %v2496_v24 = vpop.eup %2495  ;;  %v1906_v33 = vadd.f32 -0.6931472, %v737_v47  ;;  %2505 = vlog2.f32 %v691_v12  ;;  %v694_v53 = vadd.f32 1.0, %v2494_v14  ;;  %v285_v26 = vpack.c.bf16 %v253_v20, %v250_v10  ;;  %v2918_v46 = vpop.permute.xlu1 %1062 }
 0x10a   :  { %v2498_v28 = vpop.eup %2497  ;;  %v1904_v31 = vadd.f32 -0.6931472, %v735_v50  ;;  %2507 = vlog2.f32 %v696_v16  ;;  %v697_v32 = vadd.f32 1.0, %v2496_v24  ;;  %2205 = vmatpush3.bf16.msra.mxu0 %v284_v51  ;;  %v1066_v27 = vpop.permute.xlu0 %1065  ;;  %v616_v8 = vmax.f32 %v2892_v35, 0.0 }
 0x10b   :  { %v2500_v34 = vpop.eup %2499  ;;  %2509 = vlog2.f32 %v694_v53  ;;  %v695_v36 = vadd.f32 1.0, %v2498_v28  ;;  %v765_v37 = vpack.c.bf16 %v1906_v33, %v1905_v15  ;;  %2206 = vmatprep.subr.bf16.mxu0 %v285_v26  ;;  %v617_v23 = vmax.f32 %v2900_v43, 0.0 }
 0x10c   :  { %v2502_v39 = vpop.eup %2501  ;;  %v719_v42 = vmul.f32 0.6931472, %v2500_v34  ;;  %2511 = vlog2.f32 %v697_v32  ;;  %v764_v45 = vpack.c.bf16 %v1904_v31, %v1903_v29  ;;  %v615_v21 = vmax.f32 %v2907_v63, 0.0 }
 0x10d   :  { %v2504_v41 = vpop.eup %2503  ;;  %2513 = vlog2.f32 %v695_v36  ;;  %v2146_v48 = vpop.f32.mrb[12].mxu0  ;;  %v715_v57 = vmul.f32 0.6931472, %v2502_v39  ;;  %vm1103_vm5 = vcmp.eq.s32.totalorder %v2918_v46, %v2833_v19  ;;  %vm1104_vm6 = vcmp.eq.s32.totalorder %v1066_v27, %v2833_v19 }
 0x10e   :  { %v740_v49 = vadd.f32 %v719_v42, %v612_v40  ;;  %v721_v54 = vmul.f32 0.6931472, %v2504_v41  ;;  %2186 = vmatprep.mubr.bf16.mxu1 %v764_v45  ;;  %v266_v55 = vpop.f32.mrb[13].mxu0  ;;  %2207 = vmatpush3.bf16.msra.mxu0 %v285_v26  ;;  %v1069_v1 = vpop.permute.xlu1 %1068  ;;  %vm1942_vm8 = vmpackc.low %vm1103_vm5, %vm1102_vm4  ;;  %v1286_v42 = vshrl.u32 %v1034_v18, 7  ;;  %v1956_v45 = vld [vmem:[%s3127_s3] ss:$0 sm:$0xff] }
 0x10f   :  { %2187 = vmatmul.mubr.bf16.gmra.mrb[20].mxu1 %v765_v37  ;;  %v2147_v56 = vpop.f32.mrb[14].mxu0  ;;  %2208 = vmatprep.subr.bf16.mxu0 %v286_v17  ;;  %v738_v2 = vadd.f32 %v715_v57, %v610_v60  ;;  %v1072_v35 = vpop.permute.xlu0 %1071  ;;  %vm1105_vm7 = vcmp.eq.s32.totalorder %v1069_v1, %v2833_v19  ;;  %v2545_v18 = vmov 0.0|0.0   ;;  %v2407_v1 = vld [vmem:[%s3135_s11 + $0x20] sm:$0xff]  }
 0x110   :  { %v741_v0 = vadd.f32 %v721_v54, %v613_v52  ;;  %v288_v25 = vpack.c.bf16 %v2147_v56, %v2146_v48  ;;  %v269_v51 = vpop.f32.mrb[15].mxu0  ;;  %v1909_v59 = vadd.f32 -0.6931472, %v740_v49  ;;  %vm1944_vm9 = vmpackc.low %vm1105_vm7, %vm1104_vm6  ;;  %vm1106_vm10 = vcmp.eq.s32.totalorder %v1072_v35, %v2833_v19  ;;  %v2403_v56 = vld [vmem:[%s3135_s11] sm:$0xff]  }
 0x111   :  { %v287_v58 = vpack.c.bf16 %v269_v51, %v266_v55  ;;  %v1907_v15 = vadd.f32 -0.6931472, %v738_v2  ;;  %v1287_v41 = vadd.s32 8, %v1286_v42  ;;  %v1288_v46 = vadd.s32 16, %v1286_v42 }
 0x112   :  { %v1910_v61 = vadd.f32 -0.6931472, %v741_v0  ;;  %2209 = vmatpush3.bf16.msra.mxu0 %v286_v17  ;;  %v1075_v20 = vpop.permute.xlu1 %1074  ;;  %v1289_v48 = vadd.s32 24, %v1286_v42  ;;  %v1290_v49 = vadd.s32 32, %v1286_v42  ;;  %v1291_v52 = vadd.s32 40, %v1286_v42 }
 0x113   :  { %v2506_v62 = vpop.eup %2505  ;;  %2210 = vmatprep.subr.bf16.mxu0 %v287_v58  ;;  %v1078_v31 = vpop.permute.xlu0 %1077  ;;  %vm1107_vm11 = vcmp.eq.s32.totalorder %v1075_v20, %v2833_v19  ;;  %v1293_v54 = vadd.s32 56, %v1286_v42  ;;  %v1294_v57 = vadd.s32 64, %v1286_v42  ;;  %v1295_v0 = vadd.s32 72, %v1286_v42 }
 0x114   :  { %v2508_v7 = vpop.eup %2507  ;;  %v717_v5 = vmul.f32 0.6931472, %v2506_v62  ;;  %v767_v30 = vpack.c.bf16 %v1910_v61, %v1909_v59  ;;  %vm1108_vm12 = vcmp.eq.s32.totalorder %v1078_v31, %v2833_v19  ;;  %vm1946_vm14 = vmpackc.low %vm1107_vm11, %vm1106_vm10  ;;  %vm1308_vm10 = vcmp.eq.s32.totalorder %v1287_v41, %v1956_v45  ;;  %v2406_v59 = vld [vmem:[%s3135_s11 + $0x18] sm:$0xff]  }
 0x115   :  { %v2510_v6 = vpop.eup %2509  ;;  %v727_v9 = vmul.f32 0.6931472, %v2508_v7  ;;  %vm1309_vm11 = vcmp.eq.s32.totalorder %v1288_v46, %v1956_v45  ;;  %v1297_v51 = vadd.s32 88, %v1286_v42  ;;  %v1298_v60 = vadd.s32 96, %v1286_v42  ;;  %v2408_v7 = vld [vmem:[%s3135_s11 + $0x28] sm:$0xff]  }
 0x116   :  { %v2512_v44 = vpop.eup %2511  ;;  %v739_v10 = vadd.f32 %v717_v5, %v611_v4  ;;  %v723_v11 = vmul.f32 0.6931472, %v2510_v6  ;;  %2211 = vmatpush3.bf16.msra.mxu0 %v287_v58  ;;  %v1081_v13 = vpop.permute.xlu1 %1080  ;;  %v1299_v61 = vadd.s32 104, %v1286_v42  ;;  %v1300_v62 = vadd.s32 112, %v1286_v42  ;;  %v2405_v58 = vld [vmem:[%s3135_s11 + $0x10] sm:$0xff]  }
 0x117   :  { %v2514_v47 = vpop.eup %2513  ;;  %v744_v12 = vadd.f32 %v727_v9, %v616_v8  ;;  %v729_v14 = vmul.f32 0.6931472, %v2512_v44  ;;  %2212 = vmatprep.subr.bf16.mxu0 %v288_v25  ;;  %vm1109_vm13 = vcmp.eq.s32.totalorder %v1081_v13, %v2833_v19  ;;  %v1084_v32 = vpop.permute.xlu0 %1083  ;;  %v1301_v27 = vadd.s32 120, %v1286_v42 }
 0x118   :  { %v1908_v50 = vadd.f32 -0.6931472, %v739_v10  ;;  %v742_v16 = vadd.f32 %v723_v11, %v614_v3  ;;  %v725_v17 = vmul.f32 0.6931472, %v2514_v47  ;;  %vm1948_vm15 = vmpackc.low %vm1109_vm13, %vm1108_vm12  ;;  %vm1110_vm0 = vcmp.eq.s32.totalorder %v1084_v32, %v2833_v19 }
 0x119   :  { %v745_v24 = vadd.f32 %v729_v14, %v617_v23  ;;  %v1913_v38 = vadd.f32 -0.6931472, %v744_v12  ;;  %vm1310_vm12 = vcmp.eq.s32.totalorder %v1289_v48, %v1956_v45  ;;  %v2986_v23 = vld [vmem:[%s3133_s9] ss:$0 sm:$0xff]  ;;  %v2547_v55 = vmov 0.0  }
 0x11a   :  { %v743_v33 = vadd.f32 %v725_v17, %v615_v21  ;;  %v766_v53 = vpack.c.bf16 %v1908_v50, %v1907_v15  ;;  %v1911_v63 = vadd.f32 -0.6931472, %v742_v16  ;;  %2213 = vmatpush3.bf16.msra.mxu0 %v288_v25  ;;  %v1087_v34 = vpop.permute.xlu1 %1086  ;;  %v1296_v25 = vadd.s32 80, %v1286_v42 }
 0x11b   :  { %v1914_v43 = vadd.f32 -0.6931472, %v745_v24  ;;  %vm1111_vm1 = vcmp.eq.s32.totalorder %v1087_v34, %v2833_v19  ;;  %v1090_v36 = vpop.permute.xlu0 %1089  ;;  %2338 = vmatprep.subr.bf16.mxu0 %v2545_v18 }
 0x11c   :  { %v1912_v26 = vadd.f32 -0.6931472, %v743_v33  ;;  %2190 = vmatprep.mubr.bf16.mxu1 %v766_v53  ;;  %vm1112_vm2 = vcmp.eq.s32.totalorder %v1090_v36, %v2833_v19  ;;  %vm1950_vm4 = vmpackc.low %vm1111_vm1, %vm1110_vm0  ;;  %vm1312_vm0 = vcmp.eq.s32.totalorder %v1291_v52, %v1956_v45 }
 0x11d   :  { %2191 = vmatmul.mubr.bf16.gmra.mrb[24].mxu1 %v767_v30  ;;  %v769_v28 = vpack.c.bf16 %v1914_v43, %v1913_v38  ;;  %2215 = vmatmul.mubr.msk.bf16.vlgmr.msra.gmra.mrb[16].mxu0 %vm1942_vm8, %v2544_v22 }
 0x11e   :  { %v768_v29 = vpack.c.bf16 %v1912_v26, %v1911_v63  ;;  %2218 = vmatprep.mubr.msk.bf16.mxu0 %vm1944_vm9, %v2544_v22  ;;  %v1093_v37 = vpop.permute.xlu1 %1092  ;;  %vm1307_vm9 = vcmp.eq.s32.totalorder %v1286_v42, %v1956_v45 }
 0x11f   :  { %vm1113_vm3 = vcmp.eq.s32.totalorder %v1093_v37, %v2833_v19  ;;  %v1096_v39 = vpop.permute.xlu0 %1095  ;;  %vm1973_vm13 = vmpackc.low %vm1308_vm10, %vm1307_vm9  ;;  %vm1318_vm9 = vcmp.eq.s32.totalorder %v1297_v51, %v1956_v45 }
 0x120   :  { %2194 = vmatprep.mubr.bf16.mxu1 %v768_v29  ;;  %vm1952_vm5 = vmpackc.low %vm1113_vm3, %vm1112_vm2  ;;  %vm1114_vm6 = vcmp.eq.s32.totalorder %v1096_v39, %v2833_v19  ;;  %vm1314_vm2 = vcmp.eq.s32.totalorder %v1293_v54, %v1956_v45 }
 0x122   :  { %v1099_v40 = vpop.permute.xlu1 %1098 }
 0x123   :  { %vm1115_vm7 = vcmp.eq.s32.totalorder %v1099_v40, %v2833_v19  ;;  %v1292_v19 = vadd.s32 48, %v1286_v42  ;;  %v941_v6 = vpop.permute.xlu0 %940 }
 0x124   :  { %vm1954_vm8 = vmpackc.low %vm1115_vm7, %vm1114_vm6  ;;  %vm1316_vm6 = vcmp.eq.s32.totalorder %v1295_v0, %v1956_v45 }
 0x125   :  { %2195 = vmatmul.mubr.bf16.gmra.mrb[28].mxu1 %v769_v28  ;;  %2219 = vmatmul.mubr.msk.bf16.gmra.mrb[20].mxu0 %vm1946_vm14, %v2544_v22  ;;  %vm2955_vm14 = vmpackc.low %vm1310_vm12, %vm1309_vm11  ;;  %vm1313_vm1 = vcmp.eq.s32.totalorder %v1292_v19, %v1956_v45  ;;  %vm1319_vm11 = vcmp.eq.s32.totalorder %v1298_v60, %v1956_v45  ;;  %vm1320_vm12 = vcmp.eq.s32.totalorder %v1299_v61, %v1956_v45 }
 0x126   :  { %2222 = vmatprep.mubr.msk.bf16.mxu0 %vm1948_vm15, %v2544_v22  ;;  %2246 = vmatprep.mubr.msk.bf16.mxu1 %vm1973_vm13, %v2544_v22  ;;  %vm1311_vm15 = vcmp.eq.s32.totalorder %v1290_v49, %v1956_v45  ;;  %vm2975_vm13 = vmpackc.low %vm1320_vm12, %vm1319_vm11  ;;  %v946_v8 = vpop.permute.xlu1 %945 }
 0x127   :  { %vm2959_vm3 = vmpackc.low %vm1312_vm0, %vm1311_vm15  ;;  %vm1321_vm15 = vcmp.eq.s32.totalorder %v1300_v62, %v1956_v45  ;;  %vm1322_vm0 = vcmp.eq.s32.totalorder %v1301_v27, %v1956_v45  ;;  %v951_v10 = vpop.permute.xlu0 %950 }
 0x12a   :  { %v956_v11 = vpop.permute.xlu1 %955 }
 0x12b   :  { %v961_v12 = vpop.permute.xlu0 %960 }
 0x12d   :  { %2223 = vmatmul.mubr.msk.bf16.gmra.mrb[24].mxu0 %vm1950_vm4, %v2544_v22  ;;  %vm2963_vm4 = vmpackc.low %vm1314_vm2, %vm1313_vm1 }
 0x12e   :  { %2226 = vmatprep.mubr.msk.bf16.mxu0 %vm1952_vm5, %v2544_v22  ;;  %vm1315_vm5 = vcmp.eq.s32.totalorder %v1294_v57, %v1956_v45  ;;  %vm2979_vm1 = vmpackc.low %vm1322_vm0, %vm1321_vm15  ;;  %v966_v14 = vpop.permute.xlu1 %965 }
 0x12f   :  { %vm2967_vm7 = vmpackc.low %vm1316_vm6, %vm1315_vm5  ;;  %v971_v16 = vpop.permute.xlu0 %970 }
 0x132   :  { %v976_v20 = vpop.permute.xlu1 %975 }
 0x133   :  { %v981_v39 = vpop.permute.xlu0 %980 }
 0x135   :  { %2227 = vmatmul.mubr.msk.bf16.gmra.mrb[28].mxu0 %vm1954_vm8, %v2544_v22  ;;  %vm1317_vm8 = vcmp.eq.s32.totalorder %v1296_v25, %v1956_v45 }
 0x136   :  { %vm2971_vm10 = vmpackc.low %vm1318_vm9, %vm1317_vm8  ;;  %v986_v46 = vpop.permute.xlu1 %985 }
 0x137   :  { %v991_v27 = vpop.permute.xlu0 %990 }
 0x1da   :  { %v2184_v2 = vpop.f32.mrb[16].mxu1 }
 0x1db   :  { %v875_v4 = vpop.f32.mrb[17].mxu1  ;;  %v884_v21 = vadd.f32 %v2184_v2, %v2986_v23 }
 0x1dc   :  { %v2185_v5 = vpop.f32.mrb[18].mxu1  ;;  %v876_v15 = vadd.f32 %v2986_v23, %v875_v4 }
 0x1dd   :  { %v878_v30 = vpop.f32.mrb[19].mxu1  ;;  %v887_v50 = vadd.f32 %v2185_v5, %v2986_v23  ;;  %v1020_v33 = vmul.f32 %v951_v10, %v884_v21 }
 0x1de   :  { %v879_v17 = vadd.f32 %v2986_v23, %v878_v30  ;;  %v1018_v43 = vmul.f32 %v941_v6, %v876_v15  ;;  %v1001_v15 = vpop.permute.xlu0 %1000 }
 0x1df   :  { %v1021_v29 = vmul.f32 %v956_v11, %v887_v50 }
 0x1e0   :  { %v1019_v32 = vmul.f32 %v946_v8, %v879_v17 }
 0x1e2   :  { %v2188_v9 = vpop.f32.mrb[20].mxu1 }
 0x1e3   :  { %v891_v44 = vpop.f32.mrb[21].mxu1  ;;  %v900_v34 = vadd.f32 %v2188_v9, %v2986_v23  ;;  %v996_v9 = vpop.permute.xlu1 %995 }
 0x1e4   :  { %v2189_v3 = vpop.f32.mrb[22].mxu1  ;;  %v892_v40 = vadd.f32 %v2986_v23, %v891_v44 }
 0x1e5   :  { %v894_v47 = vpop.f32.mrb[23].mxu1  ;;  %v903_v45 = vadd.f32 %v2189_v3, %v2986_v23  ;;  %v1024_v54 = vmul.f32 %v971_v16, %v900_v34 }
 0x1e6   :  { %v895_v48 = vadd.f32 %v2986_v23, %v894_v47  ;;  %v1022_v25 = vmul.f32 %v961_v12, %v892_v40 }
 0x1e7   :  { %v1025_v62 = vmul.f32 %v976_v20, %v903_v45  ;;  %v1006_v20 = vpop.permute.xlu1 %1005 }
 0x1e8   :  { %v1023_v5 = vmul.f32 %v966_v14, %v895_v48 }
 0x1f0   :  { %v2192_v35 = vpop.f32.mrb[24].mxu1  ;;  %v2216_v38 = vpop.f32.mrb[16].mxu0 }
 0x1f1   :  { %v907_v24 = vpop.f32.mrb[25].mxu1  ;;  %v1263_v26 = vmul.f32 %v2216_v38, %v1020_v33  ;;  %v1198_v28 = vpop.f32.mrb[17].mxu0  ;;  %v916_v30 = vadd.f32 %v2192_v35, %v2986_v23 }
 0x1f2   :  { %v2193_v53 = vpop.f32.mrb[26].mxu1  ;;  %v1261_v31 = vmul.f32 %v1198_v28, %v1018_v43  ;;  %v2217_v13 = vpop.f32.mrb[18].mxu0  ;;  %v908_v44 = vadd.f32 %v2986_v23, %v907_v24 }
 0x1f3   :  { %v910_v63 = vpop.f32.mrb[27].mxu1  ;;  %v1264_v36 = vmul.f32 %v2217_v13, %v1021_v29  ;;  %v1201_v37 = vpop.f32.mrb[19].mxu0  ;;  %v919_v3 = vadd.f32 %v2193_v53, %v2986_v23  ;;  %v1028_v21 = vmul.f32 %v991_v27, %v916_v30 }
 0x1f4   :  { %v1262_v42 = vmul.f32 %v1201_v37, %v1019_v32  ;;  %v911_v47 = vadd.f32 %v2986_v23, %v910_v63  ;;  %v1026_v14 = vmul.f32 %v981_v39, %v908_v44  ;;  %v1011_v13 = vpop.permute.xlu0 %1010  ;;  %v1016_v37 = vpop.permute.xlu1 %1015 }
 0x1f5   :  { %v1278_v41 = vpack.c.bf16 %v1264_v36, %v1263_v26  ;;  %v1029_v35 = vmul.f32 %v996_v9, %v919_v3 }
 0x1f6   :  { %v1277_v52 = vpack.c.bf16 %v1262_v42, %v1261_v31  ;;  %v1027_v38 = vmul.f32 %v986_v46, %v911_v47 }
 0x1f8   :  { %v2196_v49 = vpop.f32.mrb[28].mxu1  ;;  %v2220_v0 = vpop.f32.mrb[20].mxu0  ;;  %2230 = vmatprep.subr.bf16.mxu1 %v1277_v52 }
 0x1f9   :  { %v923_v19 = vpop.f32.mrb[29].mxu1  ;;  %v1267_v60 = vmul.f32 %v2220_v0, %v1024_v54  ;;  %v1214_v61 = vpop.f32.mrb[21].mxu0  ;;  %2231 = vmatpush3.bf16.msra.mxu1 %v1277_v52  ;;  %v932_v53 = vadd.f32 %v2196_v49, %v2986_v23  ;;  %v2409_v0 = vld [vmem:[%s3135_s11 + $0x30] sm:$0xff]  }
 0x1fa   :  { %v2197_v57 = vpop.f32.mrb[30].mxu1  ;;  %v1265_v2 = vmul.f32 %v1214_v61, %v1022_v25  ;;  %v2221_v4 = vpop.f32.mrb[22].mxu0  ;;  %2232 = vmatprep.subr.bf16.mxu1 %v1278_v41  ;;  %v924_v63 = vadd.f32 %v2986_v23, %v923_v19 }
 0x1fb   :  { %v926_v51 = vpop.f32.mrb[31].mxu1  ;;  %v1268_v6 = vmul.f32 %v2221_v4, %v1025_v62  ;;  %v1217_v8 = vpop.f32.mrb[23].mxu0  ;;  %v935_v29 = vadd.f32 %v2197_v57, %v2986_v23  ;;  %v1032_v36 = vmul.f32 %v1011_v13, %v932_v53  ;;  %v2417_v13 = vld [vmem:[%s3137_s13 + $0x30] sm:$0xff]  }
 0x1fc   :  { %v1266_v10 = vmul.f32 %v1217_v8, %v1023_v5  ;;  %v927_v32 = vadd.f32 %v2986_v23, %v926_v51  ;;  %v1030_v40 = vmul.f32 %v1001_v15, %v924_v63  ;;  %v2413_v63 = vld [vmem:[%s3137_s13 + $0x10] sm:$0xff]  }
 0x1fd   :  { %v1280_v11 = vpack.c.bf16 %v1268_v6, %v1267_v60  ;;  %2233 = vmatpush3.bf16.msra.mxu1 %v1278_v41  ;;  %v1033_v41 = vmul.f32 %v1016_v37, %v935_v29  ;;  %v2415_v29 = vld [vmem:[%s3137_s13 + $0x20] sm:$0xff]  }
 0x1fe   :  { %v1279_v12 = vpack.c.bf16 %v1266_v10, %v1265_v2  ;;  %v1031_v49 = vmul.f32 %v1006_v20, %v927_v32  ;;  %v2418_v32 = vld [vmem:[%s3137_s13 + $0x38] sm:$0xff]  }
 0x200   :  { %v2224_v50 = vpop.f32.mrb[24].mxu0  ;;  %2234 = vmatprep.subr.bf16.mxu1 %v1279_v12 }
 0x201   :  { %v1271_v16 = vmul.f32 %v2224_v50, %v1028_v21  ;;  %v1230_v17 = vpop.f32.mrb[25].mxu0  ;;  %2235 = vmatpush3.bf16.msra.mxu1 %v1279_v12 }
 0x202   :  { %v1269_v33 = vmul.f32 %v1230_v17, %v1026_v14  ;;  %v2225_v24 = vpop.f32.mrb[26].mxu0  ;;  %2236 = vmatprep.subr.bf16.mxu1 %v1280_v11  ;;  %v1511_v17 = vld [vmem:[%s3129_s5] sm:$0xf] }
 0x203   :  { %v1272_v43 = vmul.f32 %v2225_v24, %v1029_v35  ;;  %v1233_v26 = vpop.f32.mrb[27].mxu0  ;;  %v2410_v35 = vld [vmem:[%s3135_s11 + $0x38] sm:$0xff]  }
 0x204   :  { %v1270_v28 = vmul.f32 %v1233_v26, %v1027_v38  ;;  %v2412_v26 = vld [vmem:[%s3137_s13 + $0x8] sm:$0xff]  }
 0x205   :  { %v1282_v31 = vpack.c.bf16 %v1272_v43, %v1271_v16  ;;  %2237 = vmatpush3.bf16.msra.mxu1 %v1280_v11  ;;  %v2411_v43 = vld [vmem:[%s3137_s13] sm:$0xff]  }
 0x206   :  { %v1281_v34 = vpack.c.bf16 %v1270_v28, %v1269_v33  ;;  %v2414_v28 = vld [vmem:[%s3137_s13 + $0x18] sm:$0xff]  }
 0x208   :  { %v2228_v39 = vpop.f32.mrb[28].mxu0  ;;  %2238 = vmatprep.subr.bf16.mxu1 %v1281_v34 }
 0x209   :  { %v1275_v42 = vmul.f32 %v2228_v39, %v1032_v36  ;;  %v1246_v45 = vpop.f32.mrb[29].mxu0  ;;  %2239 = vmatpush3.bf16.msra.mxu1 %v1281_v34  ;;  %v1989_v34 = vld [vmem:[%s3136_s12] ss:$0 sm:$0xff] }
 0x20a   :  { %v1273_v46 = vmul.f32 %v1246_v45, %v1030_v40  ;;  %v2229_v48 = vpop.f32.mrb[30].mxu0  ;;  %2240 = vmatprep.subr.bf16.mxu1 %v1282_v31 }
 0x20b   :  { %v1276_v52 = vmul.f32 %v2229_v48, %v1033_v41  ;;  %v1249_v19 = vpop.f32.mrb[31].mxu0 }
 0x20c   :  { %v1274_v54 = vmul.f32 %v1249_v19, %v1031_v49 }
 0x20d   :  { %v1284_v57 = vpack.c.bf16 %v1276_v52, %v1275_v42  ;;  %2241 = vmatpush3.bf16.msra.mxu1 %v1282_v31  ;;  %v2416_v31 = vld [vmem:[%s3137_s13 + $0x28] sm:$0xff]  }
 0x20e   :  { %v1283_v23 = vpack.c.bf16 %v1274_v54, %v1273_v46 }
 0x210   :  { %2242 = vmatprep.subr.bf16.mxu1 %v1283_v23 }
 0x211   :  { %2243 = vmatpush3.bf16.msra.mxu1 %v1283_v23 }
 0x212   :  { %2244 = vmatprep.subr.bf16.mxu1 %v1284_v57 }
 0x215   :  { %2245 = vmatpush3.bf16.msra.mxu1 %v1284_v57 }
 0x216   :  { %2298 = vmatprep.subr.bf16.mxu1 %v2547_v55 }
 0x218   :  { %2247 = vmatmul.mubr.msk.bf16.vlgmr.msra.gmra.mrb[32].mxu1 %vm2955_vm14, %v2544_v22  ;;  %vm2546_vm14 = vmmov 0  }
 0x219   :  { %2250 = vmatprep.mubr.msk.bf16.mxu1 %vm2959_vm3, %v2544_v22  ;;  %2294 = vmatprep.mubr.msk.bf16.mxu0 %vm2546_vm14, %v2547_v55 }
 0x21a   :  { %2299 = vmatpush3.bf16.msra.mxu1 %v2403_v56 }
 0x21b   :  { %2300 = vmatprep.subr.bf16.mxu1 %v2547_v55 }
 0x220   :  { %2251 = vmatmul.mubr.msk.bf16.gmra.mrb[36].mxu1 %vm2963_vm4, %v2544_v22 }
 0x221   :  { %2254 = vmatprep.mubr.msk.bf16.mxu1 %vm2967_vm7, %v2544_v22 }
 0x228   :  { %2255 = vmatmul.mubr.msk.bf16.gmra.mrb[40].mxu1 %vm2971_vm10, %v2544_v22 }
 0x229   :  { %2258 = vmatprep.mubr.msk.bf16.mxu1 %vm2975_vm13, %v2544_v22 }
 0x230   :  { %2259 = vmatmul.mubr.msk.bf16.gmra.mrb[44].mxu1 %vm2979_vm1, %v2544_v22  ;;  %v2404_v22 = vld [vmem:[%s3135_s11 + $0x8] sm:$0xff]  }
 0x231   :  { %2314 = vmatprep.mubr.msk.bf16.mxu1 %vm2546_vm14, %v2547_v55  ;;  %2301 = vmatpush3.bf16.msra.mxu1 %v2404_v22 }
 0x232   :  { %2302 = vmatprep.subr.bf16.mxu1 %v2547_v55 }
 0x235   :  { %2303 = vmatpush3.bf16.msra.mxu1 %v2405_v58 }
 0x236   :  { %2304 = vmatprep.subr.bf16.mxu1 %v2547_v55 }
 0x239   :  { %2305 = vmatpush3.bf16.msra.mxu1 %v2406_v59 }
 0x23a   :  { %2306 = vmatprep.subr.bf16.mxu1 %v2547_v55 }
 0x23d   :  { %2307 = vmatpush3.bf16.msra.mxu1 %v2407_v1 }
 0x23e   :  { %2308 = vmatprep.subr.bf16.mxu1 %v2547_v55 }
 0x241   :  { %2309 = vmatpush3.bf16.msra.mxu1 %v2408_v7 }
 0x242   :  { %2310 = vmatprep.subr.bf16.mxu1 %v2547_v55 }
 0x245   :  { %2311 = vmatpush3.bf16.msra.mxu1 %v2409_v0 }
 0x246   :  { %2312 = vmatprep.subr.bf16.mxu1 %v2547_v55 }
 0x249   :  { %2313 = vmatpush3.bf16.msra.mxu1 %v2410_v35 }
 0x2eb   :  { %v2248_v25 = vpop.f32.mrb[32].mxu1 }
 0x2ec   :  { %v1413_v51 = vpop.f32.mrb[33].mxu1 }
 0x2ed   :  { %v2249_v60 = vpop.f32.mrb[34].mxu1 }
 0x2ee   :  { %v2342_v61 = vpack.c.bf16 %v2249_v60, %v2248_v25  ;;  %v1416_v62 = vpop.f32.mrb[35].mxu1 }
 0x2ef   :  { %v2339_v27 = vpack.c.bf16 %v1416_v62, %v1413_v51 }
 0x2f1   :  { %2340 = vmatpush3.bf16.msra.mxu0 %v2339_v27 }
 0x2f2   :  { %2341 = vmatprep.subr.bf16.mxu0 %v2545_v18 }
 0x2f3   :  { %v2252_v2 = vpop.f32.mrb[36].mxu1 }
 0x2f4   :  { %v1429_v4 = vpop.f32.mrb[37].mxu1 }
 0x2f5   :  { %v2253_v5 = vpop.f32.mrb[38].mxu1  ;;  %2343 = vmatpush3.bf16.msra.mxu0 %v2342_v61 }
 0x2f6   :  { %v2348_v30 = vpack.c.bf16 %v2253_v5, %v2252_v2  ;;  %v1432_v6 = vpop.f32.mrb[39].mxu1  ;;  %2344 = vmatprep.subr.bf16.mxu0 %v2545_v18 }
 0x2f7   :  { %v2345_v8 = vpack.c.bf16 %v1432_v6, %v1429_v4 }
 0x2f9   :  { %2346 = vmatpush3.bf16.msra.mxu0 %v2345_v8 }
 0x2fa   :  { %2347 = vmatprep.subr.bf16.mxu0 %v2545_v18 }
 0x2fb   :  { %v2256_v9 = vpop.f32.mrb[40].mxu1 }
 0x2fc   :  { %v1445_v44 = vpop.f32.mrb[41].mxu1 }
 0x2fd   :  { %v2257_v10 = vpop.f32.mrb[42].mxu1  ;;  %2349 = vmatpush3.bf16.msra.mxu0 %v2348_v30 }
 0x2fe   :  { %v2354_v3 = vpack.c.bf16 %v2257_v10, %v2256_v9  ;;  %v1448_v11 = vpop.f32.mrb[43].mxu1  ;;  %2350 = vmatprep.subr.bf16.mxu0 %v2545_v18 }
 0x2ff   :  { %v2351_v47 = vpack.c.bf16 %v1448_v11, %v1445_v44 }
 0x301   :  { %2352 = vmatpush3.bf16.msra.mxu0 %v2351_v47 }
 0x302   :  { %2353 = vmatprep.subr.bf16.mxu0 %v2545_v18 }
 0x303   :  { %v2260_v12 = vpop.f32.mrb[44].mxu1 }
 0x304   :  { %v1461_v21 = vpop.f32.mrb[45].mxu1 }
 0x305   :  { %v2261_v15 = vpop.f32.mrb[46].mxu1  ;;  %2355 = vmatpush3.bf16.msra.mxu0 %v2354_v3 }
 0x306   :  { %v2360_v50 = vpack.c.bf16 %v2261_v15, %v2260_v12  ;;  %v1464_v14 = vpop.f32.mrb[47].mxu1  ;;  %2356 = vmatprep.subr.bf16.mxu0 %v2545_v18 }
 0x307   :  { %v2357_v16 = vpack.c.bf16 %v1464_v14, %v1461_v21 }
 0x309   :  { %2358 = vmatpush3.bf16.msra.mxu0 %v2357_v16 }
 0x30a   :  { %2359 = vmatprep.subr.bf16.mxu0 %v2545_v18 }
 0x30d   :  { %2361 = vmatpush3.bf16.msra.mxu0 %v2360_v50 }
 0x30e   :  { %2318 = vmatprep.subr.bf16.mxu0 %v2547_v55 }
 0x310   :  { %2295 = vmatmul.mubr.bf16.vlgmr.msra.gmra.mrb[32].mxu0 %v1511_v17 }
 0x311   :  { %2334 = vmatprep.mubr.msk.bf16.mxu0 %vm2546_vm14, %v2547_v55  ;;  %2319 = vmatpush3.bf16.msra.mxu0 %v2411_v43 }
 0x312   :  { %2320 = vmatprep.subr.bf16.mxu0 %v2547_v55 }
 0x315   :  { %2321 = vmatpush3.bf16.msra.mxu0 %v2412_v26 }
 0x316   :  { %2322 = vmatprep.subr.bf16.mxu0 %v2547_v55 }
 0x319   :  { %2323 = vmatpush3.bf16.msra.mxu0 %v2413_v63 }
 0x31a   :  { %2324 = vmatprep.subr.bf16.mxu0 %v2547_v55 }
 0x31d   :  { %2325 = vmatpush3.bf16.msra.mxu0 %v2414_v28 }
 0x31e   :  { %2326 = vmatprep.subr.bf16.mxu0 %v2547_v55 }
 0x321   :  { %2327 = vmatpush3.bf16.msra.mxu0 %v2415_v29 }
 0x322   :  { %2328 = vmatprep.subr.bf16.mxu0 %v2547_v55 }
 0x325   :  { %2329 = vmatpush3.bf16.msra.mxu0 %v2416_v31 }
 0x326   :  { %2330 = vmatprep.subr.bf16.mxu0 %v2547_v55 }
 0x329   :  { %2331 = vmatpush3.bf16.msra.mxu0 %v2417_v13 }
 0x32a   :  { %2332 = vmatprep.subr.bf16.mxu0 %v2547_v55  ;;  %v1999_v55 = vld [vmem:[%s3138_s14] ss:$0 sm:$0xff] }
 0x32d   :  { %2333 = vmatpush3.bf16.msra.mxu0 %v2418_v32 }
 0x3e3   :  { %v1594_v20 = vpop.f32.mrb[32].mxu0 }
 0x3e4   :  { %v1600_v33 = vpack.c.bf16 %v1594_v20, %v1594_v20  ;;  %v2296_v24 = vpop.f32.mrb[33].mxu0 }
 0x3e5   :  { %v1597_v38 = vpop.f32.mrb[34].mxu0 }
 0x3e6   :  { %v2297_v53 = vpop.f32.mrb[35].mxu0  ;;  %2315 = vmatmul.mubr.bf16.vlgmr.msra.gmra.mrb[48].mxu1 %v1600_v33 }
 0x4b9   :  { %v1706_v36 = vpop.f32.mrb[48].mxu1 }
 0x4ba   :  { %v1707_v37 = vadd.f32 %v1989_v34, %v1706_v36  ;;  %v2316_v39 = vpop.f32.mrb[49].mxu1 }
 0x4bb   :  { %v1709_v40 = vpop.f32.mrb[50].mxu1 }
 0x4bc   :  { %v1713_v42 = vand.u32 2147483647, %v1707_v37  ;;  %v2317_v45 = vpop.f32.mrb[51].mxu1  ;;  %v1712_v19 = vmax.f32 %v1707_v37, 0.0 }
 0x4be   :  { %v1714_v41 = vsub.f32 0.0, %v1713_v42 }
 0x4c0   :  { %v1715_v46 = vmul.f32 1.442695, %v1714_v41 }
 0x4c2   :  { %2515 = vpow2.f32 %v1715_v46 }
 0x4cc   :  { %v2516_v48 = vpop.eup %2515 }
 0x4cd   :  { %v1717_v49 = vadd.f32 1.0, %v2516_v48 }
 0x4cf   :  { %2517 = vlog2.f32 %v1717_v49 }
 0x4d9   :  { %v2518_v52 = vpop.eup %2517 }
 0x4da   :  { %v1719_v54 = vmul.f32 0.6931472, %v2518_v52 }
 0x4dc   :  { %v1720_v57 = vadd.f32 %v1719_v54, %v1712_v19 }
 0x4de   :  { %v1998_v23 = vadd.f32 -0.6931472, %v1720_v57 }
 0x4e0   :  { %v1722_v18 = vpack.c.bf16 %v1998_v23, %v1998_v23 }
 0x4e2   :  { %2335 = vmatmul.mubr.bf16.vlgmr.msra.gmra.mrb[36].mxu0 %v1722_v18 }
 0x5b5   :  { %v1828_v56 = vpop.f32.mrb[36].mxu0 }
 0x5b6   :  { %v1829_v22 = vadd.f32 %v1999_v55, %v1828_v56  ;;  %v2336_v58 = vpop.f32.mrb[37].mxu0 }
 0x5b7   :  { %v1831_v59 = vpop.f32.mrb[38].mxu0 }
 0x5b8   :  { %1834 = vst [vmem:[#allocation4] sm:$0xff] %v1829_v22  ;;  %v2337_v1 = vpop.f32.mrb[39].mxu0 }
 0x5b9   :  { %2530 = shalt.err (!%p2527_p4)
}
 0x5ba   :  { %s2531_s14 = scalar_lea.hbm %s3139_s15, 128 }
 0x5bb   :  { %p2532_p5 = scmp.ne.s32.totalorder %s3139_s15, %s2531_s14  ;;  %p2535_p6 = scmp.lt.u32.totalorder %s2531_s14, %s3139_s15 }
 0x5bd   :  { %p2537_p7 = pnand %p2535_p6, %p2532_p5 }
 0x5bf   :  { %2540 = shalt.err (!%p2537_p7)
}
 0x5c0   :  { %1844 = dma.vmem_to_hbm [thread:$0]  %s1842_s30, 128, %s3139_s15, [#allocation5]  }
 0x5c1   :  { %2541 = dma.done.wait [#allocation5], 128  }
 0x5c2   :  { %2542 = vsyncadd [#allocation5], 4294967168 }
 0x5c3   :  { %1848 = vsyncpa [#allocation5], 1 }

</bundles_post_ra>
